<compile_context>
chip_gen: v6e
topology: v6e:2x2x1
jax: 0.10.0
libtpu: 0.0.40
codegen_flags: <defaults>
</compile_context>

<pallas_src>
import functools

import jax
import jax.numpy as jnp
from jax.experimental import pallas as pl
from jax.experimental.pallas import tpu as pltpu


OUT_PAD = 128   # lane-dense padded projection width (sliced back to output_dim outside)
SUBLANE = 8


# ----------------------------------------------------------------------------
# Config / deterministic parameter init (synthetic small CLIP-ViT visual tower)
# ----------------------------------------------------------------------------
class Cfg:
    in_ch = 3
    image = 16
    patch = 8
    width = 32
    heads = 4
    layers = 2
    output_dim = 16

    @property
    def grid(self):
        return self.image // self.patch

    @property
    def seq(self):
        return self.grid * self.grid + 1


def init_params(key, cfg):
    kiter = iter(jax.random.split(key, 64))

    def nrm(shape, scale=0.02):
        return scale * jax.random.normal(next(kiter), shape, dtype=jnp.float32)

    w = cfg.width
    patch_dim = cfg.in_ch * cfg.patch * cfg.patch
    layers = []
    for _ in range(cfg.layers):
        layers.append(dict(
            ln1_g=jnp.ones((w,), jnp.float32), ln1_b=jnp.zeros((w,), jnp.float32),
            attn_in_w=nrm((w, 3 * w)), attn_in_b=jnp.zeros((3 * w,), jnp.float32),
            attn_out_w=nrm((w, w)), attn_out_b=jnp.zeros((w,), jnp.float32),
            ln2_g=jnp.ones((w,), jnp.float32), ln2_b=jnp.zeros((w,), jnp.float32),
            fc1_w=nrm((w, 4 * w)), fc1_b=jnp.zeros((4 * w,), jnp.float32),
            fc2_w=nrm((4 * w, w)), fc2_b=jnp.zeros((w,), jnp.float32),
        ))
    return dict(
        conv_w=nrm((patch_dim, w)),                       # conv1 (no bias in CLIP)
        class_embedding=nrm((w,)),
        pos_embedding=nrm((cfg.seq, w)),
        ln_pre_g=jnp.ones((w,), jnp.float32), ln_pre_b=jnp.zeros((w,), jnp.float32),
        layers=layers,
        ln_post_g=jnp.ones((w,), jnp.float32), ln_post_b=jnp.zeros((w,), jnp.float32),
        proj=nrm((w, cfg.output_dim)),
    )


# ----------------------------------------------------------------------------
# Kernels
# ----------------------------------------------------------------------------
def _ln(x, g, b, eps):
    mu = jnp.mean(x, axis=-1, keepdims=True)
    var = jnp.mean(jnp.square(x - mu), axis=-1, keepdims=True)
    return (x - mu) * jax.lax.rsqrt(var + eps) * g + b


def _pre_kernel(patch_ref, conv_w_ref, pos_cls_ref, g_ref, b_ref, x0_ref,
                *, bb, S_pad, width, eps):
    # Patch-embed matmul; CLS/pad rows of the slab are zero so their embedding is zero.
    emb = jnp.dot(patch_ref[...], conv_w_ref[...],
                  preferred_element_type=jnp.float32)          # (bb*S_pad, width)
    # CLS embedding is already folded into row 0 of pos_cls; pad rows are zero.
    x = emb.reshape(bb, S_pad, width) + pos_cls_ref[...]
    x = _ln(x, g_ref[...], b_ref[...], eps)
    x0_ref[...] = x.reshape(bb * S_pad, width)


def _layer_kernel(x0_ref, vec_ref, w_in_ref, w_out_ref, fc1_w_ref, fc2_w_ref,
                  ln_pg_ref, ln_pb_ref, proj_ref,
                  out_ref,
                  x_sc,
                  *, bb, S, S_pad, width, heads, dh, eps):
    l = pl.program_id(1)
    w = width
    rows = bb * S_pad

    # ---- first layer step for this batch block: load pre-stage activations ----
    @pl.when(l == 0)
    def _init():
        x_sc[...] = x0_ref[...]

    x = x_sc[...]                                              # (rows, width) f32
    vecs = vec_ref[0]                                          # (8, 4*width) packed f32

    # ---- multi-head self-attention (per-image; padded keys masked in-kernel) ----
    y = _ln(x, vecs[0:1, 0:w], vecs[1:2, 0:w], eps)
    qkv = jnp.dot(y.astype(jnp.bfloat16), w_in_ref[0],
                  preferred_element_type=jnp.float32) + vecs[2:3, 0:3 * w]

    kidx = jax.lax.broadcasted_iota(jnp.int32, (S_pad, S_pad), 1)
    kmask = jnp.where(kidx < S, jnp.float32(0.0), jnp.float32(-1e30))  # mask pad keys

    scale = dh ** -0.5
    heads_out = []
    # TODO(synk): convert to lax.fori_loop (carrying an accumulator) at 12-16 heads, and
    # pre-split the in-proj weights per-head to avoid sub-128 lane slices at real widths.
    for h in range(heads):
        q = (qkv[:, h * dh:(h + 1) * dh] * scale).astype(jnp.bfloat16)
        k = qkv[:, w + h * dh: w + (h + 1) * dh].astype(jnp.bfloat16)
        v = qkv[:, 2 * w + h * dh: 2 * w + (h + 1) * dh].astype(jnp.bfloat16)
        q = q.reshape(bb, S_pad, dh)
        k = k.reshape(bb, S_pad, dh)
        v = v.reshape(bb, S_pad, dh)
        s = jnp.einsum('bqd,bkd->bqk', q, k,
                       preferred_element_type=jnp.float32) + kmask
        s = s - jnp.max(s, axis=-1, keepdims=True)
        p = jnp.exp(s)
        p = p * pl.reciprocal(jnp.sum(p, axis=-1, keepdims=True), approx=True)
        o = jnp.einsum('bqk,bkd->bqd', p.astype(jnp.bfloat16), v,
                       preferred_element_type=jnp.float32)     # (bb, S_pad, dh)
        heads_out.append(o.reshape(rows, dh).astype(jnp.bfloat16))

    # Head-concat then ONE K=width out-projection matmul (fills the MXU contraction).
    attn_cat = jnp.concatenate(heads_out, axis=-1)             # (rows, width) bf16
    attn = jnp.dot(attn_cat, w_out_ref[0], preferred_element_type=jnp.float32)
    x = x + attn + vecs[3:4, 0:w]

    # ---- MLP: fc1 -> QuickGELU -> fc2, residual fused ----
    y = _ln(x, vecs[4:5, 0:w], vecs[5:6, 0:w], eps)
    hdn = jnp.dot(y.astype(jnp.bfloat16), fc1_w_ref[0],
                  preferred_element_type=jnp.float32) + vecs[6:7, 0:4 * w]
    hdn = hdn * jax.nn.sigmoid(1.702 * hdn)                    # QuickGELU (f32, chip-safe)
    x = x + jnp.dot(hdn.astype(jnp.bfloat16), fc2_w_ref[0],
                    preferred_element_type=jnp.float32) + vecs[7:8, 0:w]
    x_sc[...] = x

    # ---- last layer step: ln_post + projection on the CLS rows only ----
    @pl.when(l == pl.num_programs(1) - 1)
    def _post():
        cls = x.reshape(bb, S_pad, w)[:, 0:1, :].reshape(bb, w)
        cls = _ln(cls, ln_pg_ref[...], ln_pb_ref[...], eps)
        pc = jnp.dot(cls.astype(jnp.bfloat16), proj_ref[...],
                     preferred_element_type=jnp.float32)       # (bb, OUT_PAD) lane-dense
        out_ref[...] = pc[None].astype(out_ref.dtype)


# ----------------------------------------------------------------------------
# Wrapper: layout prep + pre-stage call + main layer-grid call
# ----------------------------------------------------------------------------
def encode_image(params, images, cfg, *, batch_block=1):
    """images: NCHW float32 (B, 3, H, W) -> (B, output_dim)."""
    B, C, H, W_img = images.shape
    p = cfg.patch
    gh, gw = H // p, W_img // p
    P = gh * gw
    S = P + 1
    S_pad = ((S + SUBLANE - 1) // SUBLANE) * SUBLANE
    w = cfg.width
    heads = cfg.heads
    dh = w // heads
    L = cfg.layers
    bb = batch_block
    assert B % bb == 0
    nb = B // bb
    patch_dim = C * p * p
    eps = 1e-5

    # conv1 (stride = patch) as patch-flatten + matmul; flatten order (c, kh, kw).
    patches = (images.reshape(B, C, gh, p, gw, p)
               .transpose(0, 2, 4, 1, 3, 5)
               .reshape(B, P, patch_dim))
    # Row-padded slab: row 0 of each image = CLS slot (zeros), rows 1..S-1 = patches,
    # rows S..S_pad-1 = padding (masked as attention keys, dropped at output).
    slab = jnp.zeros((B, S_pad, patch_dim), jnp.float32)
    slab = slab.at[:, 1:S, :].set(patches)
    slab = slab.reshape(B * S_pad, patch_dim).astype(jnp.bfloat16)

    # CLS embedding folded into a row-padded positional table (pre-stage is one add).
    pos_cls = jnp.zeros((S_pad, w), jnp.float32)
    pos_cls = pos_cls.at[0].set(params["pos_embedding"][0] + params["class_embedding"])
    pos_cls = pos_cls.at[1:S].set(params["pos_embedding"][1:S])

    # ---- pre-stage pallas_call (patch-embed + pos/CLS + ln_pre) ----
    x0 = pl.pallas_call(
        functools.partial(_pre_kernel, bb=bb, S_pad=S_pad, width=w, eps=eps),
        out_shape=jax.ShapeDtypeStruct((B * S_pad, w), jnp.float32),
        grid_spec=pltpu.PrefetchScalarGridSpec(
            num_scalar_prefetch=0, grid=(nb,),
            in_specs=[
                pl.BlockSpec((bb * S_pad, patch_dim), lambda b: (b, 0)),
                pl.BlockSpec((patch_dim, w), lambda b: (0, 0)),
                pl.BlockSpec((S_pad, w), lambda b: (0, 0)),
                pl.BlockSpec((1, w), lambda b: (0, 0)),
                pl.BlockSpec((1, w), lambda b: (0, 0)),
            ],
            out_specs=pl.BlockSpec((bb * S_pad, w), lambda b: (b, 0))),
        compiler_params=pltpu.CompilerParams(
            dimension_semantics=("parallel",),
            vmem_limit_bytes=32 * 1024 * 1024),
    )(slab,
      params["conv_w"].astype(jnp.bfloat16),
      pos_cls,
      params["ln_pre_g"].reshape(1, w),
      params["ln_pre_b"].reshape(1, w))

    # ---- per-layer weights: big matrices stacked; small vectors packed into one DMA ----
    stack = lambda name: jnp.stack([lyr[name] for lyr in params["layers"]])

    def pack_vec(lyr):
        v = jnp.zeros((8, 4 * w), jnp.float32)
        v = v.at[0, :w].set(lyr["ln1_g"])
        v = v.at[1, :w].set(lyr["ln1_b"])
        v = v.at[2, :3 * w].set(lyr["attn_in_b"])
        v = v.at[3, :w].set(lyr["attn_out_b"])
        v = v.at[4, :w].set(lyr["ln2_g"])
        v = v.at[5, :w].set(lyr["ln2_b"])
        v = v.at[6, :4 * w].set(lyr["fc1_b"])
        v = v.at[7, :w].set(lyr["fc2_b"])
        return v

    vec_stack = jnp.stack([pack_vec(lyr) for lyr in params["layers"]])   # (L, 8, 4w)

    # Final projection padded to 128 lanes so the HBM store writes full vregs.
    proj_pad = jnp.zeros((w, OUT_PAD), jnp.float32)
    proj_pad = proj_pad.at[:, :cfg.output_dim].set(params["proj"]).astype(jnp.bfloat16)

    per_layer = lambda shape: pl.BlockSpec((1,) + shape, lambda b, l: (l, 0, 0))
    const = lambda shape: pl.BlockSpec(shape, lambda b, l: (0,) * len(shape))

    kern = functools.partial(
        _layer_kernel, bb=bb, S=S, S_pad=S_pad, width=w, heads=heads, dh=dh, eps=eps)

    out3 = pl.pallas_call(
        kern,
        out_shape=jax.ShapeDtypeStruct((nb, bb, OUT_PAD), jnp.float32),
        grid_spec=pltpu.PrefetchScalarGridSpec(
            num_scalar_prefetch=0,
            grid=(nb, L),
            in_specs=[
                pl.BlockSpec((bb * S_pad, w), lambda b, l: (b, 0)),   # pre-stage acts
                per_layer((8, 4 * w)),                                # packed LN/bias vecs
                per_layer((w, 3 * w)),                                # attn in-proj W
                per_layer((w, w)),                                    # attn out-proj W
                per_layer((w, 4 * w)),                                # fc1 W
                per_layer((4 * w, w)),                                # fc2 W
                const((1, w)), const((1, w)),                         # ln_post gamma/beta
                const((w, OUT_PAD)),                                  # projection (padded)
            ],
            out_specs=pl.BlockSpec((1, bb, OUT_PAD), lambda b, l: (b, 0, 0)),
            scratch_shapes=[pltpu.VMEM((bb * S_pad, w), jnp.float32)]),
        compiler_params=pltpu.CompilerParams(
            # batch axis parallel (v7x 2 TCs); layer axis is inherently sequential
            dimension_semantics=("parallel", "arbitrary"),
            vmem_limit_bytes=32 * 1024 * 1024),
    )(x0,
      vec_stack,
      stack("attn_in_w").astype(jnp.bfloat16),
      stack("attn_out_w").astype(jnp.bfloat16),
      stack("fc1_w").astype(jnp.bfloat16),
      stack("fc2_w").astype(jnp.bfloat16),
      params["ln_post_g"].reshape(1, w),
      params["ln_post_b"].reshape(1, w),
      proj_pad)

    return out3.reshape(B, OUT_PAD)[:, :cfg.output_dim]


if __name__ == "__main__":
    cfg = Cfg()
    key = jax.random.PRNGKey(0)
    k_param, k_img = jax.random.split(key)
    params = init_params(k_param, cfg)
    images = jax.random.normal(k_img, (2, cfg.in_ch, cfg.image, cfg.image),
                               dtype=jnp.float32)

    fwd = jax.jit(lambda imgs: encode_image(params, imgs, cfg))
    out = fwd(images)
    jax.block_until_ready(out)
    assert out.shape == (2, cfg.output_dim), out.shape
    assert out.dtype == jnp.float32
    assert bool(jnp.all(jnp.isfinite(out)))
    print("KERNEL_OK")
</pallas_src>

<mosaic_0001>
module attributes {stable_mosaic.version = 11 : i64} {
  func.func @_pre_kernel(%arg0: i32, %arg1: memref<8x192xbf16, #tpu.memory_space<vmem>>, %arg2: memref<192x32xbf16, #tpu.memory_space<vmem>>, %arg3: memref<8x32xf32, #tpu.memory_space<vmem>>, %arg4: memref<1x32xf32, #tpu.memory_space<vmem>>, %arg5: memref<1x32xf32, #tpu.memory_space<vmem>>, %arg6: memref<8x32xf32, #tpu.memory_space<vmem>>) attributes {dimension_semantics = [#tpu.dimension_semantics<parallel>], iteration_bounds = array<i64: 2>, scalar_prefetch = 0 : i64, scratch_operands = 0 : i64, tpu.core_type = #tpu.core_type<tc>, window_params = [{transform_indices = @transform_0, window_bounds = array<i64: 8, 192>}, {pipeline_mode = #tpu.pipeline_mode<synchronous>, transform_indices = @transform_1, window_bounds = array<i64: 192, 32>}, {pipeline_mode = #tpu.pipeline_mode<synchronous>, transform_indices = @transform_2, window_bounds = array<i64: 8, 32>}, {pipeline_mode = #tpu.pipeline_mode<synchronous>, transform_indices = @transform_3, window_bounds = array<i64: 1, 32>}, {pipeline_mode = #tpu.pipeline_mode<synchronous>, transform_indices = @transform_4, window_bounds = array<i64: 1, 32>}, {transform_indices = @transform_5, window_bounds = array<i64: 8, 32>}]} {
    %c0 = arith.constant 0 : index
    %c0_0 = arith.constant 0 : index
    %0 = vector.load %arg1[%c0, %c0_0] : memref<8x192xbf16, #tpu.memory_space<vmem>>, vector<8x192xbf16>
    %c0_1 = arith.constant 0 : index
    %c0_2 = arith.constant 0 : index
    %1 = vector.load %arg2[%c0_1, %c0_2] : memref<192x32xbf16, #tpu.memory_space<vmem>>, vector<192x32xbf16>
    %cst = arith.constant dense<0.000000e+00> : vector<8x32xf32>
    %2 = tpu.matmul %0, %1, %cst {dimension_numbers = #tpu.dot_dimension_numbers<[1], [0], [0], [1], [0, 0, 1, 1], [], []>} : vector<8x192xbf16>, vector<192x32xbf16>, vector<8x32xf32> -> vector<8x32xf32>
    %3 = vector.shape_cast %2 : vector<8x32xf32> to vector<1x8x32xf32>
    %c0_3 = arith.constant 0 : index
    %c0_4 = arith.constant 0 : index
    %4 = vector.load %arg3[%c0_3, %c0_4] : memref<8x32xf32, #tpu.memory_space<vmem>>, vector<8x32xf32>
    %5 = vector.shape_cast %4 : vector<8x32xf32> to vector<1x8x32xf32>
    %6 = arith.addf %3, %5 : vector<1x8x32xf32>
    %c0_5 = arith.constant 0 : index
    %c0_6 = arith.constant 0 : index
    %7 = vector.load %arg4[%c0_5, %c0_6] : memref<1x32xf32, #tpu.memory_space<vmem>>, vector<1x32xf32>
    %c0_7 = arith.constant 0 : index
    %c0_8 = arith.constant 0 : index
    %8 = vector.load %arg5[%c0_7, %c0_8] : memref<1x32xf32, #tpu.memory_space<vmem>>, vector<1x32xf32>
    %cst_9 = arith.constant dense<0.000000e+00> : vector<1x8xf32>
    %9 = vector.multi_reduction <add>, %6, %cst_9 [2] : vector<1x8x32xf32> to vector<1x8xf32>
    %10 = vector.shape_cast %9 : vector<1x8xf32> to vector<1x8x1xf32>
    %cst_10 = arith.constant 3.200000e+01 : f32
    %11 = vector.broadcast %cst_10 : f32 to vector<1x8x1xf32>
    %12 = arith.divf %10, %11 : vector<1x8x1xf32>
    %13 = vector.broadcast %12 : vector<1x8x1xf32> to vector<1x8x32xf32>
    %14 = arith.subf %6, %13 : vector<1x8x32xf32>
    %15 = arith.mulf %14, %14 : vector<1x8x32xf32>
    %cst_11 = arith.constant dense<0.000000e+00> : vector<1x8xf32>
    %16 = vector.multi_reduction <add>, %15, %cst_11 [2] : vector<1x8x32xf32> to vector<1x8xf32>
    %17 = vector.shape_cast %16 : vector<1x8xf32> to vector<1x8x1xf32>
    %cst_12 = arith.constant 3.200000e+01 : f32
    %18 = vector.broadcast %cst_12 : f32 to vector<1x8x1xf32>
    %19 = arith.divf %17, %18 : vector<1x8x1xf32>
    %20 = vector.broadcast %12 : vector<1x8x1xf32> to vector<1x8x32xf32>
    %21 = arith.subf %6, %20 : vector<1x8x32xf32>
    %cst_13 = arith.constant 9.99999974E-6 : f32
    %22 = vector.broadcast %cst_13 : f32 to vector<1x8x1xf32>
    %23 = arith.addf %19, %22 : vector<1x8x1xf32>
    %24 = math.rsqrt %23 : vector<1x8x1xf32>
    %25 = vector.broadcast %24 : vector<1x8x1xf32> to vector<1x8x32xf32>
    %26 = arith.mulf %21, %25 : vector<1x8x32xf32>
    %27 = vector.shape_cast %7 : vector<1x32xf32> to vector<1x1x32xf32>
    %28 = vector.broadcast %27 : vector<1x1x32xf32> to vector<1x8x32xf32>
    %29 = arith.mulf %26, %28 : vector<1x8x32xf32>
    %30 = vector.shape_cast %8 : vector<1x32xf32> to vector<1x1x32xf32>
    %31 = vector.broadcast %30 : vector<1x1x32xf32> to vector<1x8x32xf32>
    %32 = arith.addf %29, %31 : vector<1x8x32xf32>
    %33 = vector.shape_cast %32 : vector<1x8x32xf32> to vector<8x32xf32>
    %c0_14 = arith.constant 0 : index
    %c0_15 = arith.constant 0 : index
    %34 = vector.load %arg6[%c0_14, %c0_15] : memref<8x32xf32, #tpu.memory_space<vmem>>, vector<8x32xf32>
    tpu.vector_store %arg6[%c0_14, %c0_15], %33 {strides = array<i32>} : memref<8x32xf32, #tpu.memory_space<vmem>>, vector<8x32xf32>,
    return
  }
  func.func @transform_0(%arg0: i32) -> (i32, i32) {
    %c0_i32 = arith.constant 0 : i32
    %c0_i32_0 = arith.constant 0 : i32
    return %arg0, %c0_i32 : i32, i32
  }
  func.func @transform_1(%arg0: i32) -> (i32, i32) {
    %c0_i32 = arith.constant 0 : i32
    %c0_i32_0 = arith.constant 0 : i32
    %c0_i32_1 = arith.constant 0 : i32
    return %c0_i32, %c0_i32_0 : i32, i32
  }
  func.func @transform_2(%arg0: i32) -> (i32, i32) {
    %c0_i32 = arith.constant 0 : i32
    %c0_i32_0 = arith.constant 0 : i32
    %c0_i32_1 = arith.constant 0 : i32
    return %c0_i32, %c0_i32_0 : i32, i32
  }
  func.func @transform_3(%arg0: i32) -> (i32, i32) {
    %c0_i32 = arith.constant 0 : i32
    %c0_i32_0 = arith.constant 0 : i32
    %c0_i32_1 = arith.constant 0 : i32
    return %c0_i32, %c0_i32_0 : i32, i32
  }
  func.func @transform_4(%arg0: i32) -> (i32, i32) {
    %c0_i32 = arith.constant 0 : i32
    %c0_i32_0 = arith.constant 0 : i32
    %c0_i32_1 = arith.constant 0 : i32
    return %c0_i32, %c0_i32_0 : i32, i32
  }
  func.func @transform_5(%arg0: i32) -> (i32, i32) {
    %c0_i32 = arith.constant 0 : i32
    %c0_i32_0 = arith.constant 0 : i32
    return %arg0, %c0_i32 : i32, i32
  }
}

module attributes {stable_mosaic.version = 11 : i64} {
  func.func @_layer_kernel(%arg0: i32, %arg1: i32, %arg2: memref<8x32xf32, #tpu.memory_space<vmem>>, %arg3: memref<1x8x128xf32, #tpu.memory_space<vmem>>, %arg4: memref<1x32x96xbf16, #tpu.memory_space<vmem>>, %arg5: memref<1x32x32xbf16, #tpu.memory_space<vmem>>, %arg6: memref<1x32x128xbf16, #tpu.memory_space<vmem>>, %arg7: memref<1x128x32xbf16, #tpu.memory_space<vmem>>, %arg8: memref<1x32xf32, #tpu.memory_space<vmem>>, %arg9: memref<1x32xf32, #tpu.memory_space<vmem>>, %arg10: memref<32x128xbf16, #tpu.memory_space<vmem>>, %arg11: memref<1x1x128xf32, #tpu.memory_space<vmem>>, %arg12: memref<8x32xf32, #tpu.memory_space<vmem>>) attributes {dimension_semantics = [#tpu.dimension_semantics<parallel>, #tpu.dimension_semantics<arbitrary>], iteration_bounds = array<i64: 2, 2>, scalar_prefetch = 0 : i64, scratch_operands = 1 : i64, tpu.core_type = #tpu.core_type<tc>, window_params = [{transform_indices = @transform_0, window_bounds = array<i64: 8, 32>}, {transform_indices = @transform_1, window_bounds = array<i64: 1, 8, 128>}, {transform_indices = @transform_2, window_bounds = array<i64: 1, 32, 96>}, {transform_indices = @transform_3, window_bounds = array<i64: 1, 32, 32>}, {transform_indices = @transform_4, window_bounds = array<i64: 1, 32, 128>}, {transform_indices = @transform_5, window_bounds = array<i64: 1, 128, 32>}, {pipeline_mode = #tpu.pipeline_mode<synchronous>, transform_indices = @transform_6, window_bounds = array<i64: 1, 32>}, {pipeline_mode = #tpu.pipeline_mode<synchronous>, transform_indices = @transform_7, window_bounds = array<i64: 1, 32>}, {pipeline_mode = #tpu.pipeline_mode<synchronous>, transform_indices = @transform_8, window_bounds = array<i64: 32, 128>}, {transform_indices = @transform_9, window_bounds = array<i64: 1, 1, 128>}]} {
    %c0_i32 = arith.constant 0 : i32
    %0 = arith.cmpi eq, %arg1, %c0_i32 : i32
    %1 = arith.extui %0 : i1 to i32
    %c0_i32_0 = arith.constant 0 : i32
    %2 = arith.cmpi ne, %1, %c0_i32_0 : i32
    scf.if %2 {
      %c0_57 = arith.constant 0 : index
      %c0_58 = arith.constant 0 : index
      %214 = vector.load %arg2[%c0_57, %c0_58] : memref<8x32xf32, #tpu.memory_space<vmem>>, vector<8x32xf32>
      %c0_59 = arith.constant 0 : index
      %c0_60 = arith.constant 0 : index
      %215 = vector.load %arg12[%c0_59, %c0_60] : memref<8x32xf32, #tpu.memory_space<vmem>>, vector<8x32xf32>
      tpu.vector_store %arg12[%c0_59, %c0_60], %214 {strides = array<i32>} : memref<8x32xf32, #tpu.memory_space<vmem>>, vector<8x32xf32>,
    } else {
    }
    %c0 = arith.constant 0 : index
    %c0_1 = arith.constant 0 : index
    %3 = vector.load %arg12[%c0, %c0_1] : memref<8x32xf32, #tpu.memory_space<vmem>>, vector<8x32xf32>
    %c0_2 = arith.constant 0 : index
    %c0_3 = arith.constant 0 : index
    %c0_4 = arith.constant 0 : index
    %4 = vector.load %arg3[%c0_2, %c0_3, %c0_4] : memref<1x8x128xf32, #tpu.memory_space<vmem>>, vector<1x8x128xf32>
    %5 = vector.shape_cast %4 : vector<1x8x128xf32> to vector<8x128xf32>
    %6 = vector.extract_strided_slice %5 {offsets = [0, 0], sizes = [1, 32], strides = [1, 1]} : vector<8x128xf32> to vector<1x32xf32>
    %7 = vector.extract_strided_slice %5 {offsets = [1, 0], sizes = [1, 32], strides = [1, 1]} : vector<8x128xf32> to vector<1x32xf32>
    %cst = arith.constant dense<0.000000e+00> : vector<8xf32>
    %8 = vector.multi_reduction <add>, %3, %cst [1] : vector<8x32xf32> to vector<8xf32>
    %9 = vector.shape_cast %8 : vector<8xf32> to vector<8x1xf32>
    %cst_5 = arith.constant 3.200000e+01 : f32
    %10 = vector.broadcast %cst_5 : f32 to vector<8x1xf32>
    %11 = arith.divf %9, %10 : vector<8x1xf32>
    %12 = vector.broadcast %11 : vector<8x1xf32> to vector<8x32xf32>
    %13 = arith.subf %3, %12 : vector<8x32xf32>
    %14 = arith.mulf %13, %13 : vector<8x32xf32>
    %cst_6 = arith.constant dense<0.000000e+00> : vector<8xf32>
    %15 = vector.multi_reduction <add>, %14, %cst_6 [1] : vector<8x32xf32> to vector<8xf32>
    %16 = vector.shape_cast %15 : vector<8xf32> to vector<8x1xf32>
    %cst_7 = arith.constant 3.200000e+01 : f32
    %17 = vector.broadcast %cst_7 : f32 to vector<8x1xf32>
    %18 = arith.divf %16, %17 : vector<8x1xf32>
    %19 = vector.broadcast %11 : vector<8x1xf32> to vector<8x32xf32>
    %20 = arith.subf %3, %19 : vector<8x32xf32>
    %cst_8 = arith.constant 9.99999974E-6 : f32
    %21 = vector.broadcast %cst_8 : f32 to vector<8x1xf32>
    %22 = arith.addf %18, %21 : vector<8x1xf32>
    %23 = math.rsqrt %22 : vector<8x1xf32>
    %24 = vector.broadcast %23 : vector<8x1xf32> to vector<8x32xf32>
    %25 = arith.mulf %20, %24 : vector<8x32xf32>
    %26 = vector.broadcast %6 : vector<1x32xf32> to vector<8x32xf32>
    %27 = arith.mulf %25, %26 : vector<8x32xf32>
    %28 = vector.broadcast %7 : vector<1x32xf32> to vector<8x32xf32>
    %29 = arith.addf %27, %28 : vector<8x32xf32>
    %30 = arith.truncf %29 : vector<8x32xf32> to vector<8x32xbf16>
    %c0_9 = arith.constant 0 : index
    %c0_10 = arith.constant 0 : index
    %c0_11 = arith.constant 0 : index
    %31 = vector.load %arg4[%c0_9, %c0_10, %c0_11] : memref<1x32x96xbf16, #tpu.memory_space<vmem>>, vector<1x32x96xbf16>
    %32 = vector.shape_cast %31 : vector<1x32x96xbf16> to vector<32x96xbf16>
    %cst_12 = arith.constant dense<0.000000e+00> : vector<8x96xf32>
    %33 = tpu.matmul %30, %32, %cst_12 {dimension_numbers = #tpu.dot_dimension_numbers<[1], [0], [0], [1], [0, 0, 1, 1], [], []>} : vector<8x32xbf16>, vector<32x96xbf16>, vector<8x96xf32> -> vector<8x96xf32>
    %34 = vector.extract_strided_slice %5 {offsets = [2, 0], sizes = [1, 96], strides = [1, 1]} : vector<8x128xf32> to vector<1x96xf32>
    %35 = vector.broadcast %34 : vector<1x96xf32> to vector<8x96xf32>
    %36 = arith.addf %33, %35 : vector<8x96xf32>
    %37 = tpu.iota {dimensions = array<i32: 1>} : vector<8x8xi32>
    %c5_i32 = arith.constant 5 : i32
    %38 = vector.broadcast %c5_i32 : i32 to vector<8x8xi32>
    %39 = arith.cmpi slt, %37, %38 : vector<8x8xi32>
    %cst_13 = arith.constant 0.000000e+00 : f32
    %cst_14 = arith.constant -1.000000e+30 : f32
    %40 = vector.broadcast %cst_13 : f32 to vector<8x8xf32>
    %41 = vector.broadcast %cst_14 : f32 to vector<8x8xf32>
    %42 = arith.select %39, %40, %41 : vector<8x8xi1>, vector<8x8xf32>
    %43 = vector.extract_strided_slice %36 {offsets = [0, 0], sizes = [8, 8], strides = [1, 1]} : vector<8x96xf32> to vector<8x8xf32>
    %cst_15 = arith.constant 0.353553385 : f32
    %44 = vector.broadcast %cst_15 : f32 to vector<8x8xf32>
    %45 = arith.mulf %43, %44 : vector<8x8xf32>
    %46 = arith.truncf %45 : vector<8x8xf32> to vector<8x8xbf16>
    %47 = vector.extract_strided_slice %36 {offsets = [0, 32], sizes = [8, 8], strides = [1, 1]} : vector<8x96xf32> to vector<8x8xf32>
    %48 = arith.truncf %47 : vector<8x8xf32> to vector<8x8xbf16>
    %49 = vector.extract_strided_slice %36 {offsets = [0, 64], sizes = [8, 8], strides = [1, 1]} : vector<8x96xf32> to vector<8x8xf32>
    %50 = arith.truncf %49 : vector<8x8xf32> to vector<8x8xbf16>
    %51 = vector.shape_cast %46 : vector<8x8xbf16> to vector<1x8x8xbf16>
    %52 = vector.shape_cast %48 : vector<8x8xbf16> to vector<1x8x8xbf16>
    %53 = vector.shape_cast %50 : vector<8x8xbf16> to vector<1x8x8xbf16>
    "tpu.trace_start"() <{level = 10 : i32, message = "bqd,bkd->bqk"}> : () -> ()
    %cst_16 = arith.constant dense<0.000000e+00> : vector<1x8x8xf32>
    %54 = tpu.matmul %51, %52, %cst_16 {dimension_numbers = #tpu.dot_dimension_numbers<[2], [2], [1], [1], [0, 0, 0, 1, 1, 1], [0], [0]>} : vector<1x8x8xbf16>, vector<1x8x8xbf16>, vector<1x8x8xf32> -> vector<1x8x8xf32>
    "tpu.trace_stop"() : () -> ()
    %55 = vector.shape_cast %42 : vector<8x8xf32> to vector<1x8x8xf32>
    %56 = arith.addf %54, %55 : vector<1x8x8xf32>
    %cst_17 = arith.constant dense<0xFF800000> : vector<1x8xf32>
    %57 = vector.multi_reduction <maximumf>, %56, %cst_17 [2] : vector<1x8x8xf32> to vector<1x8xf32>
    %58 = vector.shape_cast %57 : vector<1x8xf32> to vector<1x8x1xf32>
    %59 = vector.broadcast %58 : vector<1x8x1xf32> to vector<1x8x8xf32>
    %60 = arith.subf %56, %59 : vector<1x8x8xf32>
    %61 = math.exp %60 : vector<1x8x8xf32>
    %cst_18 = arith.constant dense<0.000000e+00> : vector<1x8xf32>
    %62 = vector.multi_reduction <add>, %61, %cst_18 [2] : vector<1x8x8xf32> to vector<1x8xf32>
    %63 = vector.shape_cast %62 : vector<1x8xf32> to vector<1x8x1xf32>
    %64 = tpu.reciprocal %63 {approx = true} : vector<1x8x1xf32> -> vector<1x8x1xf32>
    %65 = vector.broadcast %64 : vector<1x8x1xf32> to vector<1x8x8xf32>
    %66 = arith.mulf %61, %65 : vector<1x8x8xf32>
    %67 = arith.truncf %66 : vector<1x8x8xf32> to vector<1x8x8xbf16>
    "tpu.trace_start"() <{level = 10 : i32, message = "bqk,bkd->bqd"}> : () -> ()
    %cst_19 = arith.constant dense<0.000000e+00> : vector<1x8x8xf32>
    %68 = tpu.matmul %67, %53, %cst_19 {dimension_numbers = #tpu.dot_dimension_numbers<[2], [1], [1], [2], [0, 0, 0, 1, 1, 2], [0], [0]>} : vector<1x8x8xbf16>, vector<1x8x8xbf16>, vector<1x8x8xf32> -> vector<1x8x8xf32>
    "tpu.trace_stop"() : () -> ()
    %69 = vector.shape_cast %68 : vector<1x8x8xf32> to vector<8x8xf32>
    %70 = arith.truncf %69 : vector<8x8xf32> to vector<8x8xbf16>
    %71 = vector.extract_strided_slice %36 {offsets = [0, 8], sizes = [8, 8], strides = [1, 1]} : vector<8x96xf32> to vector<8x8xf32>
    %cst_20 = arith.constant 0.353553385 : f32
    %72 = vector.broadcast %cst_20 : f32 to vector<8x8xf32>
    %73 = arith.mulf %71, %72 : vector<8x8xf32>
    %74 = arith.truncf %73 : vector<8x8xf32> to vector<8x8xbf16>
    %75 = vector.extract_strided_slice %36 {offsets = [0, 40], sizes = [8, 8], strides = [1, 1]} : vector<8x96xf32> to vector<8x8xf32>
    %76 = arith.truncf %75 : vector<8x8xf32> to vector<8x8xbf16>
    %77 = vector.extract_strided_slice %36 {offsets = [0, 72], sizes = [8, 8], strides = [1, 1]} : vector<8x96xf32> to vector<8x8xf32>
    %78 = arith.truncf %77 : vector<8x8xf32> to vector<8x8xbf16>
    %79 = vector.shape_cast %74 : vector<8x8xbf16> to vector<1x8x8xbf16>
    %80 = vector.shape_cast %76 : vector<8x8xbf16> to vector<1x8x8xbf16>
    %81 = vector.shape_cast %78 : vector<8x8xbf16> to vector<1x8x8xbf16>
    "tpu.trace_start"() <{level = 10 : i32, message = "bqd,bkd->bqk"}> : () -> ()
    %cst_21 = arith.constant dense<0.000000e+00> : vector<1x8x8xf32>
    %82 = tpu.matmul %79, %80, %cst_21 {dimension_numbers = #tpu.dot_dimension_numbers<[2], [2], [1], [1], [0, 0, 0, 1, 1, 1], [0], [0]>} : vector<1x8x8xbf16>, vector<1x8x8xbf16>, vector<1x8x8xf32> -> vector<1x8x8xf32>
    "tpu.trace_stop"() : () -> ()
    %83 = vector.shape_cast %42 : vector<8x8xf32> to vector<1x8x8xf32>
    %84 = arith.addf %82, %83 : vector<1x8x8xf32>
    %cst_22 = arith.constant dense<0xFF800000> : vector<1x8xf32>
    %85 = vector.multi_reduction <maximumf>, %84, %cst_22 [2] : vector<1x8x8xf32> to vector<1x8xf32>
    %86 = vector.shape_cast %85 : vector<1x8xf32> to vector<1x8x1xf32>
    %87 = vector.broadcast %86 : vector<1x8x1xf32> to vector<1x8x8xf32>
    %88 = arith.subf %84, %87 : vector<1x8x8xf32>
    %89 = math.exp %88 : vector<1x8x8xf32>
    %cst_23 = arith.constant dense<0.000000e+00> : vector<1x8xf32>
    %90 = vector.multi_reduction <add>, %89, %cst_23 [2] : vector<1x8x8xf32> to vector<1x8xf32>
    %91 = vector.shape_cast %90 : vector<1x8xf32> to vector<1x8x1xf32>
    %92 = tpu.reciprocal %91 {approx = true} : vector<1x8x1xf32> -> vector<1x8x1xf32>
    %93 = vector.broadcast %92 : vector<1x8x1xf32> to vector<1x8x8xf32>
    %94 = arith.mulf %89, %93 : vector<1x8x8xf32>
    %95 = arith.truncf %94 : vector<1x8x8xf32> to vector<1x8x8xbf16>
    "tpu.trace_start"() <{level = 10 : i32, message = "bqk,bkd->bqd"}> : () -> ()
    %cst_24 = arith.constant dense<0.000000e+00> : vector<1x8x8xf32>
    %96 = tpu.matmul %95, %81, %cst_24 {dimension_numbers = #tpu.dot_dimension_numbers<[2], [1], [1], [2], [0, 0, 0, 1, 1, 2], [0], [0]>} : vector<1x8x8xbf16>, vector<1x8x8xbf16>, vector<1x8x8xf32> -> vector<1x8x8xf32>
    "tpu.trace_stop"() : () -> ()
    %97 = vector.shape_cast %96 : vector<1x8x8xf32> to vector<8x8xf32>
    %98 = arith.truncf %97 : vector<8x8xf32> to vector<8x8xbf16>
    %99 = vector.extract_strided_slice %36 {offsets = [0, 16], sizes = [8, 8], strides = [1, 1]} : vector<8x96xf32> to vector<8x8xf32>
    %cst_25 = arith.constant 0.353553385 : f32
    %100 = vector.broadcast %cst_25 : f32 to vector<8x8xf32>
    %101 = arith.mulf %99, %100 : vector<8x8xf32>
    %102 = arith.truncf %101 : vector<8x8xf32> to vector<8x8xbf16>
    %103 = vector.extract_strided_slice %36 {offsets = [0, 48], sizes = [8, 8], strides = [1, 1]} : vector<8x96xf32> to vector<8x8xf32>
    %104 = arith.truncf %103 : vector<8x8xf32> to vector<8x8xbf16>
    %105 = vector.extract_strided_slice %36 {offsets = [0, 80], sizes = [8, 8], strides = [1, 1]} : vector<8x96xf32> to vector<8x8xf32>
    %106 = arith.truncf %105 : vector<8x8xf32> to vector<8x8xbf16>
    %107 = vector.shape_cast %102 : vector<8x8xbf16> to vector<1x8x8xbf16>
    %108 = vector.shape_cast %104 : vector<8x8xbf16> to vector<1x8x8xbf16>
    %109 = vector.shape_cast %106 : vector<8x8xbf16> to vector<1x8x8xbf16>
    "tpu.trace_start"() <{level = 10 : i32, message = "bqd,bkd->bqk"}> : () -> ()
    %cst_26 = arith.constant dense<0.000000e+00> : vector<1x8x8xf32>
    %110 = tpu.matmul %107, %108, %cst_26 {dimension_numbers = #tpu.dot_dimension_numbers<[2], [2], [1], [1], [0, 0, 0, 1, 1, 1], [0], [0]>} : vector<1x8x8xbf16>, vector<1x8x8xbf16>, vector<1x8x8xf32> -> vector<1x8x8xf32>
    "tpu.trace_stop"() : () -> ()
    %111 = vector.shape_cast %42 : vector<8x8xf32> to vector<1x8x8xf32>
    %112 = arith.addf %110, %111 : vector<1x8x8xf32>
    %cst_27 = arith.constant dense<0xFF800000> : vector<1x8xf32>
    %113 = vector.multi_reduction <maximumf>, %112, %cst_27 [2] : vector<1x8x8xf32> to vector<1x8xf32>
    %114 = vector.shape_cast %113 : vector<1x8xf32> to vector<1x8x1xf32>
    %115 = vector.broadcast %114 : vector<1x8x1xf32> to vector<1x8x8xf32>
    %116 = arith.subf %112, %115 : vector<1x8x8xf32>
    %117 = math.exp %116 : vector<1x8x8xf32>
    %cst_28 = arith.constant dense<0.000000e+00> : vector<1x8xf32>
    %118 = vector.multi_reduction <add>, %117, %cst_28 [2] : vector<1x8x8xf32> to vector<1x8xf32>
    %119 = vector.shape_cast %118 : vector<1x8xf32> to vector<1x8x1xf32>
    %120 = tpu.reciprocal %119 {approx = true} : vector<1x8x1xf32> -> vector<1x8x1xf32>
    %121 = vector.broadcast %120 : vector<1x8x1xf32> to vector<1x8x8xf32>
    %122 = arith.mulf %117, %121 : vector<1x8x8xf32>
    %123 = arith.truncf %122 : vector<1x8x8xf32> to vector<1x8x8xbf16>
    "tpu.trace_start"() <{level = 10 : i32, message = "bqk,bkd->bqd"}> : () -> ()
    %cst_29 = arith.constant dense<0.000000e+00> : vector<1x8x8xf32>
    %124 = tpu.matmul %123, %109, %cst_29 {dimension_numbers = #tpu.dot_dimension_numbers<[2], [1], [1], [2], [0, 0, 0, 1, 1, 2], [0], [0]>} : vector<1x8x8xbf16>, vector<1x8x8xbf16>, vector<1x8x8xf32> -> vector<1x8x8xf32>
    "tpu.trace_stop"() : () -> ()
    %125 = vector.shape_cast %124 : vector<1x8x8xf32> to vector<8x8xf32>
    %126 = arith.truncf %125 : vector<8x8xf32> to vector<8x8xbf16>
    %127 = vector.extract_strided_slice %36 {offsets = [0, 24], sizes = [8, 8], strides = [1, 1]} : vector<8x96xf32> to vector<8x8xf32>
    %cst_30 = arith.constant 0.353553385 : f32
    %128 = vector.broadcast %cst_30 : f32 to vector<8x8xf32>
    %129 = arith.mulf %127, %128 : vector<8x8xf32>
    %130 = arith.truncf %129 : vector<8x8xf32> to vector<8x8xbf16>
    %131 = vector.extract_strided_slice %36 {offsets = [0, 56], sizes = [8, 8], strides = [1, 1]} : vector<8x96xf32> to vector<8x8xf32>
    %132 = arith.truncf %131 : vector<8x8xf32> to vector<8x8xbf16>
    %133 = vector.extract_strided_slice %36 {offsets = [0, 88], sizes = [8, 8], strides = [1, 1]} : vector<8x96xf32> to vector<8x8xf32>
    %134 = arith.truncf %133 : vector<8x8xf32> to vector<8x8xbf16>
    %135 = vector.shape_cast %130 : vector<8x8xbf16> to vector<1x8x8xbf16>
    %136 = vector.shape_cast %132 : vector<8x8xbf16> to vector<1x8x8xbf16>
    %137 = vector.shape_cast %134 : vector<8x8xbf16> to vector<1x8x8xbf16>
    "tpu.trace_start"() <{level = 10 : i32, message = "bqd,bkd->bqk"}> : () -> ()
    %cst_31 = arith.constant dense<0.000000e+00> : vector<1x8x8xf32>
    %138 = tpu.matmul %135, %136, %cst_31 {dimension_numbers = #tpu.dot_dimension_numbers<[2], [2], [1], [1], [0, 0, 0, 1, 1, 1], [0], [0]>} : vector<1x8x8xbf16>, vector<1x8x8xbf16>, vector<1x8x8xf32> -> vector<1x8x8xf32>
    "tpu.trace_stop"() : () -> ()
    %139 = vector.shape_cast %42 : vector<8x8xf32> to vector<1x8x8xf32>
    %140 = arith.addf %138, %139 : vector<1x8x8xf32>
    %cst_32 = arith.constant dense<0xFF800000> : vector<1x8xf32>
    %141 = vector.multi_reduction <maximumf>, %140, %cst_32 [2] : vector<1x8x8xf32> to vector<1x8xf32>
    %142 = vector.shape_cast %141 : vector<1x8xf32> to vector<1x8x1xf32>
    %143 = vector.broadcast %142 : vector<1x8x1xf32> to vector<1x8x8xf32>
    %144 = arith.subf %140, %143 : vector<1x8x8xf32>
    %145 = math.exp %144 : vector<1x8x8xf32>
    %cst_33 = arith.constant dense<0.000000e+00> : vector<1x8xf32>
    %146 = vector.multi_reduction <add>, %145, %cst_33 [2] : vector<1x8x8xf32> to vector<1x8xf32>
    %147 = vector.shape_cast %146 : vector<1x8xf32> to vector<1x8x1xf32>
    %148 = tpu.reciprocal %147 {approx = true} : vector<1x8x1xf32> -> vector<1x8x1xf32>
    %149 = vector.broadcast %148 : vector<1x8x1xf32> to vector<1x8x8xf32>
    %150 = arith.mulf %145, %149 : vector<1x8x8xf32>
    %151 = arith.truncf %150 : vector<1x8x8xf32> to vector<1x8x8xbf16>
    "tpu.trace_start"() <{level = 10 : i32, message = "bqk,bkd->bqd"}> : () -> ()
    %cst_34 = arith.constant dense<0.000000e+00> : vector<1x8x8xf32>
    %152 = tpu.matmul %151, %137, %cst_34 {dimension_numbers = #tpu.dot_dimension_numbers<[2], [1], [1], [2], [0, 0, 0, 1, 1, 2], [0], [0]>} : vector<1x8x8xbf16>, vector<1x8x8xbf16>, vector<1x8x8xf32> -> vector<1x8x8xf32>
    "tpu.trace_stop"() : () -> ()
    %153 = vector.shape_cast %152 : vector<1x8x8xf32> to vector<8x8xf32>
    %154 = arith.truncf %153 : vector<8x8xf32> to vector<8x8xbf16>
    %155 = tpu.concatenate %70, %98, %126, %154 in 1 : vector<8x8xbf16>, vector<8x8xbf16>, vector<8x8xbf16>, vector<8x8xbf16> -> vector<8x32xbf16>
    %c0_35 = arith.constant 0 : index
    %c0_36 = arith.constant 0 : index
    %c0_37 = arith.constant 0 : index
    %156 = vector.load %arg5[%c0_35, %c0_36, %c0_37] : memref<1x32x32xbf16, #tpu.memory_space<vmem>>, vector<1x32x32xbf16>
    %157 = vector.shape_cast %156 : vector<1x32x32xbf16> to vector<32x32xbf16>
    %cst_38 = arith.constant dense<0.000000e+00> : vector<8x32xf32>
    %158 = tpu.matmul %155, %157, %cst_38 {dimension_numbers = #tpu.dot_dimension_numbers<[1], [0], [0], [1], [0, 0, 1, 1], [], []>} : vector<8x32xbf16>, vector<32x32xbf16>, vector<8x32xf32> -> vector<8x32xf32>
    %159 = arith.addf %3, %158 : vector<8x32xf32>
    %160 = vector.extract_strided_slice %5 {offsets = [3, 0], sizes = [1, 32], strides = [1, 1]} : vector<8x128xf32> to vector<1x32xf32>
    %161 = vector.broadcast %160 : vector<1x32xf32> to vector<8x32xf32>
    %162 = arith.addf %159, %161 : vector<8x32xf32>
    %163 = vector.extract_strided_slice %5 {offsets = [4, 0], sizes = [1, 32], strides = [1, 1]} : vector<8x128xf32> to vector<1x32xf32>
    %164 = vector.extract_strided_slice %5 {offsets = [5, 0], sizes = [1, 32], strides = [1, 1]} : vector<8x128xf32> to vector<1x32xf32>
    %cst_39 = arith.constant dense<0.000000e+00> : vector<8xf32>
    %165 = vector.multi_reduction <add>, %162, %cst_39 [1] : vector<8x32xf32> to vector<8xf32>
    %166 = vector.shape_cast %165 : vector<8xf32> to vector<8x1xf32>
    %cst_40 = arith.constant 3.200000e+01 : f32
    %167 = vector.broadcast %cst_40 : f32 to vector<8x1xf32>
    %168 = arith.divf %166, %167 : vector<8x1xf32>
    %169 = vector.broadcast %168 : vector<8x1xf32> to vector<8x32xf32>
    %170 = arith.subf %162, %169 : vector<8x32xf32>
    %171 = arith.mulf %170, %170 : vector<8x32xf32>
    %cst_41 = arith.constant dense<0.000000e+00> : vector<8xf32>
    %172 = vector.multi_reduction <add>, %171, %cst_41 [1] : vector<8x32xf32> to vector<8xf32>
    %173 = vector.shape_cast %172 : vector<8xf32> to vector<8x1xf32>
    %cst_42 = arith.constant 3.200000e+01 : f32
    %174 = vector.broadcast %cst_42 : f32 to vector<8x1xf32>
    %175 = arith.divf %173, %174 : vector<8x1xf32>
    %176 = vector.broadcast %168 : vector<8x1xf32> to vector<8x32xf32>
    %177 = arith.subf %162, %176 : vector<8x32xf32>
    %cst_43 = arith.constant 9.99999974E-6 : f32
    %178 = vector.broadcast %cst_43 : f32 to vector<8x1xf32>
    %179 = arith.addf %175, %178 : vector<8x1xf32>
    %180 = math.rsqrt %179 : vector<8x1xf32>
    %181 = vector.broadcast %180 : vector<8x1xf32> to vector<8x32xf32>
    %182 = arith.mulf %177, %181 : vector<8x32xf32>
    %183 = vector.broadcast %163 : vector<1x32xf32> to vector<8x32xf32>
    %184 = arith.mulf %182, %183 : vector<8x32xf32>
    %185 = vector.broadcast %164 : vector<1x32xf32> to vector<8x32xf32>
    %186 = arith.addf %184, %185 : vector<8x32xf32>
    %187 = arith.truncf %186 : vector<8x32xf32> to vector<8x32xbf16>
    %c0_44 = arith.constant 0 : index
    %c0_45 = arith.constant 0 : index
    %c0_46 = arith.constant 0 : index
    %188 = vector.load %arg6[%c0_44, %c0_45, %c0_46] : memref<1x32x128xbf16, #tpu.memory_space<vmem>>, vector<1x32x128xbf16>
    %189 = vector.shape_cast %188 : vector<1x32x128xbf16> to vector<32x128xbf16>
    %cst_47 = arith.constant dense<0.000000e+00> : vector<8x128xf32>
    %190 = tpu.matmul %187, %189, %cst_47 {dimension_numbers = #tpu.dot_dimension_numbers<[1], [0], [0], [1], [0, 0, 1, 1], [], []>} : vector<8x32xbf16>, vector<32x128xbf16>, vector<8x128xf32> -> vector<8x128xf32>
    %191 = vector.extract_strided_slice %5 {offsets = [6, 0], sizes = [1, 128], strides = [1, 1]} : vector<8x128xf32> to vector<1x128xf32>
    %192 = vector.broadcast %191 : vector<1x128xf32> to vector<8x128xf32>
    %193 = arith.addf %190, %192 : vector<8x128xf32>
    %cst_48 = arith.constant 1.702000e+00 : f32
    %194 = vector.broadcast %cst_48 : f32 to vector<8x128xf32>
    %195 = arith.mulf %194, %193 : vector<8x128xf32>
    %196 = arith.negf %195 : vector<8x128xf32>
    %197 = math.exp %196 : vector<8x128xf32>
    %cst_49 = arith.constant 1.000000e+00 : f32
    %198 = vector.broadcast %cst_49 : f32 to vector<8x128xf32>
    %199 = arith.addf %198, %197 : vector<8x128xf32>
    %200 = arith.divf %198, %199 : vector<8x128xf32>
    %201 = arith.mulf %193, %200 : vector<8x128xf32>
    %202 = arith.truncf %201 : vector<8x128xf32> to vector<8x128xbf16>
    %c0_50 = arith.constant 0 : index
    %c0_51 = arith.constant 0 : index
    %c0_52 = arith.constant 0 : index
    %203 = vector.load %arg7[%c0_50, %c0_51, %c0_52] : memref<1x128x32xbf16, #tpu.memory_space<vmem>>, vector<1x128x32xbf16>
    %204 = vector.shape_cast %203 : vector<1x128x32xbf16> to vector<128x32xbf16>
    %cst_53 = arith.constant dense<0.000000e+00> : vector<8x32xf32>
    %205 = tpu.matmul %202, %204, %cst_53 {dimension_numbers = #tpu.dot_dimension_numbers<[1], [0], [0], [1], [0, 0, 1, 1], [], []>} : vector<8x128xbf16>, vector<128x32xbf16>, vector<8x32xf32> -> vector<8x32xf32>
    %206 = arith.addf %162, %205 : vector<8x32xf32>
    %207 = vector.extract_strided_slice %5 {offsets = [7, 0], sizes = [1, 32], strides = [1, 1]} : vector<8x128xf32> to vector<1x32xf32>
    %208 = vector.broadcast %207 : vector<1x32xf32> to vector<8x32xf32>
    %209 = arith.addf %206, %208 : vector<8x32xf32>
    %c0_54 = arith.constant 0 : index
    %c0_55 = arith.constant 0 : index
    %210 = vector.load %arg12[%c0_54, %c0_55] : memref<8x32xf32, #tpu.memory_space<vmem>>, vector<8x32xf32>
    tpu.vector_store %arg12[%c0_54, %c0_55], %209 {strides = array<i32>} : memref<8x32xf32, #tpu.memory_space<vmem>>, vector<8x32xf32>,
    %c1_i32 = arith.constant 1 : i32
    %211 = arith.cmpi eq, %arg1, %c1_i32 : i32
    %212 = arith.extui %211 : i1 to i32
    %c0_i32_56 = arith.constant 0 : i32
    %213 = arith.cmpi ne, %212, %c0_i32_56 : i32
    scf.if %213 {
      %214 = vector.shape_cast %209 : vector<8x32xf32> to vector<1x8x32xf32>
      %215 = vector.extract_strided_slice %214 {offsets = [0, 0, 0], sizes = [1, 1, 32], strides = [1, 1, 1]} : vector<1x8x32xf32> to vector<1x1x32xf32>
      %216 = vector.shape_cast %215 : vector<1x1x32xf32> to vector<1x32xf32>
      %c0_57 = arith.constant 0 : index
      %c0_58 = arith.constant 0 : index
      %217 = vector.load %arg8[%c0_57, %c0_58] : memref<1x32xf32, #tpu.memory_space<vmem>>, vector<1x32xf32>
      %c0_59 = arith.constant 0 : index
      %c0_60 = arith.constant 0 : index
      %218 = vector.load %arg9[%c0_59, %c0_60] : memref<1x32xf32, #tpu.memory_space<vmem>>, vector<1x32xf32>
      %cst_61 = arith.constant dense<0.000000e+00> : vector<1xf32>
      %219 = vector.multi_reduction <add>, %216, %cst_61 [1] : vector<1x32xf32> to vector<1xf32>
      %220 = vector.shape_cast %219 : vector<1xf32> to vector<1x1xf32>
      %cst_62 = arith.constant 3.200000e+01 : f32
      %221 = vector.broadcast %cst_62 : f32 to vector<1x1xf32>
      %222 = arith.divf %220, %221 : vector<1x1xf32>
      %223 = vector.broadcast %222 : vector<1x1xf32> to vector<1x32xf32>
      %224 = arith.subf %216, %223 : vector<1x32xf32>
      %225 = arith.mulf %224, %224 : vector<1x32xf32>
      %cst_63 = arith.constant dense<0.000000e+00> : vector<1xf32>
      %226 = vector.multi_reduction <add>, %225, %cst_63 [1] : vector<1x32xf32> to vector<1xf32>
      %227 = vector.shape_cast %226 : vector<1xf32> to vector<1x1xf32>
      %cst_64 = arith.constant 3.200000e+01 : f32
      %228 = vector.broadcast %cst_64 : f32 to vector<1x1xf32>
      %229 = arith.divf %227, %228 : vector<1x1xf32>
      %230 = vector.broadcast %222 : vector<1x1xf32> to vector<1x32xf32>
      %231 = arith.subf %216, %230 : vector<1x32xf32>
      %cst_65 = arith.constant 9.99999974E-6 : f32
      %232 = vector.broadcast %cst_65 : f32 to vector<1x1xf32>
      %233 = arith.addf %229, %232 : vector<1x1xf32>
      %234 = math.rsqrt %233 : vector<1x1xf32>
      %235 = vector.broadcast %234 : vector<1x1xf32> to vector<1x32xf32>
      %236 = arith.mulf %231, %235 : vector<1x32xf32>
      %237 = arith.mulf %236, %217 : vector<1x32xf32>
      %238 = arith.addf %237, %218 : vector<1x32xf32>
      %239 = arith.truncf %238 : vector<1x32xf32> to vector<1x32xbf16>
      %c0_66 = arith.constant 0 : index
      %c0_67 = arith.constant 0 : index
      %240 = vector.load %arg10[%c0_66, %c0_67] : memref<32x128xbf16, #tpu.memory_space<vmem>>, vector<32x128xbf16>
      %cst_68 = arith.constant dense<0.000000e+00> : vector<1x128xf32>
      %241 = tpu.matmul %239, %240, %cst_68 {dimension_numbers = #tpu.dot_dimension_numbers<[1], [0], [0], [1], [0, 0, 1, 1], [], []>} : vector<1x32xbf16>, vector<32x128xbf16>, vector<1x128xf32> -> vector<1x128xf32>
      %242 = vector.shape_cast %241 : vector<1x128xf32> to vector<1x1x128xf32>
      %c0_69 = arith.constant 0 : index
      %c0_70 = arith.constant 0 : index
      %c0_71 = arith.constant 0 : index
      %243 = vector.load %arg11[%c0_69, %c0_70, %c0_71] : memref<1x1x128xf32, #tpu.memory_space<vmem>>, vector<1x1x128xf32>
      tpu.vector_store %arg11[%c0_69, %c0_70, %c0_71], %242 {strides = array<i32>} : memref<1x1x128xf32, #tpu.memory_space<vmem>>, vector<1x1x128xf32>,
    } else {
    }
    return
  }
  func.func @transform_0(%arg0: i32, %arg1: i32) -> (i32, i32) {
    %c0_i32 = arith.constant 0 : i32
    %c0_i32_0 = arith.constant 0 : i32
    return %arg0, %c0_i32 : i32, i32
  }
  func.func @transform_1(%arg0: i32, %arg1: i32) -> (i32, i32, i32) {
    %c0_i32 = arith.constant 0 : i32
    %c0_i32_0 = arith.constant 0 : i32
    %c0_i32_1 = arith.constant 0 : i32
    return %arg1, %c0_i32, %c0_i32_0 : i32, i32, i32
  }
  func.func @transform_2(%arg0: i32, %arg1: i32) -> (i32, i32, i32) {
    %c0_i32 = arith.constant 0 : i32
    %c0_i32_0 = arith.constant 0 : i32
    %c0_i32_1 = arith.constant 0 : i32
    return %arg1, %c0_i32, %c0_i32_0 : i32, i32, i32
  }
  func.func @transform_3(%arg0: i32, %arg1: i32) -> (i32, i32, i32) {
    %c0_i32 = arith.constant 0 : i32
    %c0_i32_0 = arith.constant 0 : i32
    %c0_i32_1 = arith.constant 0 : i32
    return %arg1, %c0_i32, %c0_i32_0 : i32, i32, i32
  }
  func.func @transform_4(%arg0: i32, %arg1: i32) -> (i32, i32, i32) {
    %c0_i32 = arith.constant 0 : i32
    %c0_i32_0 = arith.constant 0 : i32
    %c0_i32_1 = arith.constant 0 : i32
    return %arg1, %c0_i32, %c0_i32_0 : i32, i32, i32
  }
  func.func @transform_5(%arg0: i32, %arg1: i32) -> (i32, i32, i32) {
    %c0_i32 = arith.constant 0 : i32
    %c0_i32_0 = arith.constant 0 : i32
    %c0_i32_1 = arith.constant 0 : i32
    return %arg1, %c0_i32, %c0_i32_0 : i32, i32, i32
  }
  func.func @transform_6(%arg0: i32, %arg1: i32) -> (i32, i32) {
    %c0_i32 = arith.constant 0 : i32
    %c0_i32_0 = arith.constant 0 : i32
    %c0_i32_1 = arith.constant 0 : i32
    return %c0_i32, %c0_i32_0 : i32, i32
  }
  func.func @transform_7(%arg0: i32, %arg1: i32) -> (i32, i32) {
    %c0_i32 = arith.constant 0 : i32
    %c0_i32_0 = arith.constant 0 : i32
    %c0_i32_1 = arith.constant 0 : i32
    return %c0_i32, %c0_i32_0 : i32, i32
  }
  func.func @transform_8(%arg0: i32, %arg1: i32) -> (i32, i32) {
    %c0_i32 = arith.constant 0 : i32
    %c0_i32_0 = arith.constant 0 : i32
    %c0_i32_1 = arith.constant 0 : i32
    return %c0_i32, %c0_i32_0 : i32, i32
  }
  func.func @transform_9(%arg0: i32, %arg1: i32) -> (i32, i32, i32) {
    %c0_i32 = arith.constant 0 : i32
    %c0_i32_0 = arith.constant 0 : i32
    %c0_i32_1 = arith.constant 0 : i32
    return %arg0, %c0_i32, %c0_i32_0 : i32, i32, i32
  }
}

</mosaic_0001>

<bundles_post_ra>
// kernel: _lambda_.2
= control target key start
LH: loop header
LB: loop body
LE: loop exit
PB: predicated region body
PF: predicated region fallthrough
CT: control target
= control target key end

     0   :  { %s550_s18 = smov 0   ;;  %s622_s0 = inlined_call_operand.vmem [shape: bf16[16,192], index: 0, kind: input, shape index: {}]   ;;  %s623_s1 = inlined_call_operand.vmem [shape: bf16[192,32], index: 1, kind: input, shape index: {}]   ;;  %s624_s2 = inlined_call_operand.vmem [shape: f32[8,32], index: 2, kind: input, shape index: {}]   ;;  %s625_s3 = inlined_call_operand.vmem [shape: f32[1,32], index: 3, kind: input, shape index: {}]   ;;  %s626_s4 = inlined_call_operand.vmem [shape: f32[1,32], index: 4, kind: input, shape index: {}]   ;;  %s627_s5 = inlined_call_operand.vmem [shape: f32[16,32], index: 5, kind: output, shape index: {}]  }
   0x1 LB: > { %s458_s19 = sadd.s32 4294967295, %s517_s18   ;;  %p462_p0 = scmp.ge.s32.totalorder %s517_s18, 1  ;;  %s517_s18 = sphi %s550_s18, %s15_s18  }
   0x2   : > { %p187_p1 = scmp.lt.s32.totalorder %s517_s18, 3 }
   0x4   : > { %p188_p2 = pnand %p462_p0, %p187_p1 }
   0x5   : > { %p214_p3 = scmp.lt.s32.totalorder (!%p188_p2), %s458_s19, 1 }
   0x6   : > { %191 = sbr.rel (%p188_p2) target bundleno = 564 (0x234), region = 40 }
   0xb   : > { %v495_v0 = vld [vmem:[%s623_s1 + $0x38] sm:$0xff]   ;;  %v519_v1 = vmov 0   ;;  %v496_v2 = vld [vmem:[%s623_s1 + $0x30] sm:$0xff]   ;;  %s629_s19 = smov (!%p214_p3, %s458_s19), 1  ;;  %v497_v3 = vld [vmem:[%s623_s1 + $0x28] sm:$0xff]   ;;  %vm327_vm0 = vcmask 523264  }
   0xc   : > { %331 = vmatprep.subr.bf16.mxu0 %v519_v1  ;;  %s485_s26 = sshll.u32 %s629_s19, 3  ;;  %v498_v4 = vld [vmem:[%s623_s1 + $0x20] sm:$0xff]   ;;  %v499_v7 = vld [vmem:[%s623_s1 + $0x18] sm:$0xff]   ;;  %v500_v8 = vld [vmem:[%s623_s1 + $0x10] sm:$0xff]   ;;  %vm375_vm1 = vcmask 261120  }
   0xd   : > { %332 = vmatpush1.bf16.msra.mxu0 %v495_v0  ;;  %s218_s29 = scalar_lea.vmem %s622_s0, %s485_s26  ;;  %v501_v9 = vld [vmem:[%s623_s1 + $0x8] sm:$0xff]   ;;  %v502_v10 = vld [vmem:[%s623_s1] sm:$0xff]   ;;  %v503_v11 = vld [vmem:[%s623_s1 + $0x58] sm:$0xff]   ;;  %s222_s9 = scalar_lea.vmem %s627_s5, %s485_s26 }
   0xe   : > { %333 = vmatprep.subr.bf16.mxu0 %v519_v1  ;;  %v224_v5 = vld [vmem:[%s218_s29] sm:$0xff]  ;;  %v504_v12 = vld [vmem:[%s623_s1 + $0x50] sm:$0xff]   ;;  %v505_v13 = vld [vmem:[%s623_s1 + $0x48] sm:$0xff]  }
   0xf   : > { %v467_v6 = vcombine.high %v224_v5, %v224_v5  ;;  %v506_v14 = vld [vmem:[%s623_s1 + $0x40] sm:$0xff]   ;;  %v466_v15 = vcombine.low %v224_v5, %v224_v5 }
  0x10   : > { %v371_v16 = vld [vmem:[%s624_s2] sm:$0xff] }
  0x11   : > { %334 = vmatpush1.bf16.msra.mxu0 %v496_v2  ;;  %480 = vmatprep.mubr.msk.bf16.mxu0 %vm327_vm0, %v467_v6  ;;  %v481_v32 = vld [vmem:[%s625_s3] ss:$0 sm:$0xff] }
  0x12   : > { %335 = vmatprep.subr.bf16.mxu0 %v519_v1  ;;  %v482_v34 = vld [vmem:[%s626_s4] ss:$0 sm:$0xff] }
  0x15   : > { %336 = vmatpush1.bf16.msra.mxu0 %v497_v3 }
  0x16   : > { %337 = vmatprep.subr.bf16.mxu0 %v519_v1 }
  0x19   : > { %338 = vmatpush1.bf16.msra.mxu0 %v498_v4 }
  0x1a   : > { %339 = vmatprep.subr.bf16.mxu0 %v519_v1 }
  0x1d   : > { %340 = vmatpush1.bf16.msra.mxu0 %v499_v7 }
  0x1e   : > { %341 = vmatprep.subr.bf16.mxu0 %v519_v1 }
  0x21   : > { %342 = vmatpush1.bf16.msra.mxu0 %v500_v8 }
  0x22   : > { %343 = vmatprep.subr.bf16.mxu0 %v519_v1 }
  0x25   : > { %344 = vmatpush1.bf16.msra.mxu0 %v501_v9 }
  0x26   : > { %345 = vmatprep.subr.bf16.mxu0 %v519_v1 }
  0x29   : > { %346 = vmatpush1.bf16.msra.mxu0 %v502_v10 }
  0x2a   : > { %355 = vmatprep.subr.bf16.mxu0 %v519_v1 }
  0x2d   : > { %356 = vmatpush2.bf16.msra.mxu0 %v503_v11 }
  0x2e   : > { %357 = vmatprep.subr.bf16.mxu0 %v519_v1 }
  0x31   : > { %358 = vmatpush2.bf16.msra.mxu0 %v504_v12 }
  0x32   : > { %359 = vmatprep.subr.bf16.mxu0 %v519_v1 }
  0x35   : > { %360 = vmatpush2.bf16.msra.mxu0 %v505_v13 }
  0x36   : > { %361 = vmatprep.subr.bf16.mxu0 %v519_v1 }
  0x39   : > { %362 = vmatpush2.bf16.msra.mxu0 %v506_v14 }
  0x3c   : > { %364 = vmatmul.mubr.bf16.vlgmr.msra.gmra.mxu0 %v466_v15 }
  0xfc   : > { %v365_v17 = vpop.f32.mrf.mxu0 }
  0xfd   : > { %v372_v18 = vadd.f32 %v371_v16, %v365_v17 }
  0xfe   : > { %v367_v19 = vpop.f32.mrf.mxu0 }
  0xff   : > { %v376_v20 = vsel %vm375_vm1, %v372_v18, 0.0 }
 0x100   : > { %377 = vadd.xlane.f32.xlu0 %v376_v20  ;;  %v368_v21 = vpop.f32.mrf.mxu0 }
 0x102   : > { %v369_v22 = vpop.f32.mrf.mxu0 }
 0x189   : > { %v378_v23 = vpop.xlane.xlu0 %377 }
 0x18a   : > { %v380_v24 = vmul.f32 0.03125, %v378_v23 }
 0x18c   : > { %v381_v25 = vsub.f32 %v372_v18, %v380_v24 }
 0x18e   : > { %v382_v26 = vmul.f32 %v381_v25, %v381_v25 }
 0x190   : > { %v383_v27 = vsel %vm375_vm1, %v382_v26, 0.0 }
 0x191   : > { %384 = vadd.xlane.f32.xlu0 %v383_v27 }
 0x21a   : > { %v385_v28 = vpop.xlane.xlu0 %384 }
 0x21b   : > { %v386_v29 = vmul.f32 0.03125, %v385_v28 }
 0x21d   : > { %v387_v30 = vadd.f32 1e-05, %v386_v29 }
 0x21f   : > { %509 = vrsqrt.f32 %v387_v30 }
 0x22c   : > { %v510_v31 = vpop.eup %509 }
 0x22d   : > { %v389_v33 = vmul.f32 %v510_v31, %v381_v25 }
 0x22f   : > { %v396_v35 = vmul.f32 %v481_v32, %v389_v33 }
 0x231   : > { %v403_v36 = vadd.f32 %v482_v34, %v396_v35 }
 0x233   : > { %404 = vst.msk [vmem:[%s222_s9] sm:$0xff] %vm375_vm1, %v403_v36 }
 0x234 PF: > { %s15_s18 = sadd.s32 1, %s517_s18  }
 0x235   : > { %p12_p4 = scmp.ge.s32.totalorder %s15_s18, 4  }
 0x237   :  { %14 = sbr.rel (!%p12_p4) target bundleno = 1 (0x1), region = 70 }

// kernel: _lambda_.3
= control target key start
LH: loop header
LB: loop body
LE: loop exit
PB: predicated region body
PF: predicated region fallthrough
CT: control target
= control target key end

     0   :  { %s2286_s0 = inlined_call_operand.vmem [shape: f32[16,32], index: 0, kind: input, shape index: {}]   ;;  %s2287_s1 = inlined_call_operand.vmem [shape: f32[2,8,128], index: 1, kind: input, shape index: {}]   ;;  %s2288_s2 = inlined_call_operand.vmem [shape: bf16[2,32,96], index: 2, kind: input, shape index: {}]   ;;  %s2289_s3 = inlined_call_operand.vmem [shape: bf16[2,32,32], index: 3, kind: input, shape index: {}]   ;;  %s2290_s4 = inlined_call_operand.vmem [shape: bf16[2,32,128], index: 4, kind: input, shape index: {}]   ;;  %s2291_s5 = inlined_call_operand.vmem [shape: bf16[2,128,32], index: 5, kind: input, shape index: {}]   ;;  %s2292_s6 = inlined_call_operand.vmem [shape: f32[1,32], index: 6, kind: input, shape index: {}]   ;;  %s2293_s7 = inlined_call_operand.vmem [shape: f32[1,32], index: 7, kind: input, shape index: {}]   ;;  %s2294_s8 = inlined_call_operand.vmem [shape: bf16[32,128], index: 8, kind: input, shape index: {}]   ;;  %s2295_s9 = inlined_call_operand.hbm [shape: f32[2,1,128], index: 9, kind: output, shape index: {}]  }
   0x1   :  { %2305 = sst [smem:[#allocation15_spill]] %s2286_s0 }
   0x2   :  { %2306 = sst [smem:[#allocation16_spill]] %s2295_s9 }
   0x3   :  { %14 = vsyncpa [#allocation4], 0 }
   0x4   :  { %16 = vsyncpa [#allocation4 + $0x1], 0  ;;  %s1985_s30 = smov 0   ;;  %s1987_s10 = smov 0  }
   0x5   :  { %s1989_s11 = smov 0   ;;  %s1991_s12 = smov 0  }
   0x6   :  { %s1993_s13 = smov 0   ;;  %s1995_s14 = smov 0  }
   0x7   :  { %s1997_s15 = smov 0   ;;  %s1999_s16 = smov 0  }
   0x8 LB: > { %2307 = sst [smem:[#allocation6_spill]] %s1885_s30  ;;  %s1499_s17 = sadd.s32 4294967295, %s1913_s16   ;;  %s1913_s16 = sphi %s1999_s16, %s22_s16   ;;  %s1909_s15 = sphi %s1997_s15, %s2330_s15   ;;  %s1905_s14 = sphi %s1995_s14, %s2329_s14   ;;  %s1901_s13 = sphi %s1993_s13, %s2328_s13   ;;  %s1897_s12 = sphi %s1991_s12, %s2327_s12   ;;  %s1893_s11 = sphi %s1989_s11, %s2326_s11   ;;  %s1889_s10 = sphi %s1987_s10, %s2332_s10   ;;  %s1885_s30 = sphi %s1985_s30, %s2331_s30  }
   0x9   : > { %2308 = sst [smem:[#allocation7_spill]] %s1893_s11  ;;  %s1500_s18 = sadd.s32 4294967294, %s1913_s16  }
   0xa   : > { %2309 = sst [smem:[#allocation8_spill]] %s1905_s14  ;;  %s31_s19 = sadd.s32 1, %s1905_s14 }
   0xb   : > { %2310 = sst [smem:[#allocation9_spill]] %s1909_s15  ;;  %p32_p0 = scmp.ge.s32.totalorder %s31_s19, 2 }
   0xc   : > { %2311 = sst [smem:[#allocation10_spill]] %s1913_s16  ;;  %s34_s20 = sadd.s32 1, %s1909_s15 }
   0xd   : > { %p270_p1 = scmp.ne.s32.totalorder %s1893_s11, %s1889_s10  ;;  %p271_p2 = scmp.eq.s32.totalorder %s1499_s17, 3 }
   0xe   : > { %s2334_s19 = smov (%p32_p0, %s31_s19), 0  ;;  %s2336_s20 = smov (!%p32_p0, %s34_s20), %s1909_s15 }
   0xf   : > { %2312 = sst [smem:[#allocation11_spill]] %s2334_s19  ;;  %p2034_p3 = por %p271_p2, %p270_p1 }
  0x10   : > { %p276_p4 = scmp.ne.s32.totalorder %s1889_s10, %s1885_s30  ;;  %p36_p5 = scmp.ge.s32.totalorder %s2336_s20, 2 }
  0x11   : > { %p277_p6 = scmp.eq.s32.totalorder %s1500_s18, 3  ;;  %p1503_p7 = scmp.ge.s32.totalorder %s1913_s16, 1 }
  0x12   : > { %p350_p8 = scmp.lt.s32.totalorder %s1913_s16, 5  ;;  %s2338_s20 = smov (%p36_p5, %s2336_s20), 0 }
  0x13   : > { %2314 = sst [smem:[#allocation12_spill]] %s2338_s20  ;;  %p2044_p9 = por %p277_p6, %p276_p4 }
  0x14   : > { %p351_p10 = pnand %p1503_p7, %p350_p8  ;;  %s257_s23 = ssub.s32 %s1909_s15, %s2338_s20 }
  0x15   : > { %s2315_s22 = scalar_select %p2044_p9, 1, 0 }
  0x16   : > { %s260_s24 = sadd.s32 1, %s1893_s11  ;;  %p258_p11 = scmp.eq.s32.totalorder %s257_s23, 0 }
  0x17   : > { %2316 = sst [smem:[#allocation13_spill]] %s2315_s22  ;;  %354 = sbr.rel (%p351_p10) target bundleno = 3035 (0xbdb), region = 56 }
  0x18   : > { %s2052_s25 = scalar_select %p258_p11, %s1893_s11, %s260_s24  }
  0x19   : > { %p408_p12 = scmp.lt.s32.totalorder (!%p351_p10), %s1901_s13, 1  ;;  %p412_p13 = scmp.lt.s32.totalorder (!%p351_p10), %s1897_s12, 1 }
  0x1a   : > { %2317 = sst [smem:[#allocation14_spill]] %s2052_s25  ;;  %s2319_s24 = sand.u32 (!%p351_p10), 1, %s1889_s10  }
  0x1b   : > { %s2318_s0 = sld [smem:[#allocation15_spill]] (!%p351_p10)  ;;  %p1514_p0 = scmp.ne.s32.totalorder (!%p351_p10), %s1897_s12, 0 }
  0x1c   : > { %s409_s27 = scalar_select %p408_p12, %s1901_s13, 1 }
  0x1d   : > { %s413_s28 = scalar_select %p412_p13, %s1897_s12, 1 }
  0x1e   : > { %s1504_s29 = sshll.u32 %s409_s27, 3 }
  0x1f   : > { %s1505_s23 = sshll.u32 %s413_s28, 3  ;;  %s1548_s14 = sshll.u32 %s413_s28, 4 }
  0x20   : > { %s2065_s15 = scalar_lea.vmem %s2287_s1, %s1505_s23  ;;  %s420_s26 = scalar_lea.vmem %s2288_s2, %s1548_s14 }
  0x21   : > { %s411_s20 = scalar_lea.vmem %s2318_s0, %s1504_s29  ;;  %s2073_s16 = scalar_lea.vmem %s2289_s3, %s1548_s14 }
  0x22   : > { %s2078_s29 = scalar_lea.vmem %s2290_s4, %s1548_s14  ;;  %s1551_s17 = sshll.u32 %s413_s28, 6 }
  0x23   : > { %s2083_s23 = scalar_lea.vmem %s2291_s5, %s1551_s17  ;;  %s2087_s0 = scalar_lea.vmem [#allocation3], %s2319_s24 }
  0x24   : > { %440 = sbr.rel (%p1514_p0) target bundleno = 43 (0x2b), region = 60 }
  0x29   : > { %v441_v0 = vld [vmem:[%s411_s20] sm:$0xff]  ;;  %vm442_vm0 = vcmask 261120  }
  0x2a   : > { %443 = vst.msk [vmem:[#allocation2] sm:$0xff] %vm442_vm0, %v441_v0 }
  0x2b PF: > { %vm446_vm1 = vcmask 261120   ;;  %v1779_v8 = vld [vmem:[%s420_s26 + $0x8] sm:$0xff]   ;;  %v1915_v9 = vmov 0.0   ;;  %vm1916_vm2 = vmmov 0   ;;  %v1780_v10 = vld [vmem:[%s420_s26] sm:$0xff]   ;;  %v461_v14 = vlaneseq  ;;  %s1917_s9 = smov 96  }
  0x2c   : > { %1589 = vmatprep.subr.bf16.mxu0 %v1915_v9  ;;  %1593 = vmatprep.mubr.msk.bf16.mxu0 %vm1916_vm2, %v1915_v9  ;;  %v2109_v17 = vld [vmem:[%s2065_s15] sm:$0xff]  ;;  %s1918_s30 = smov 120   ;;  %s1919_s11 = smov 88   ;;  %vm545_vm3 = vcmask 64512   ;;  %v1924_v48 = vmov -1e+30  }
  0x2d   : > { %1590 = vmatpush3.bf16.msra.mxu0 %v1779_v8  ;;  %1609 = vmatprep.subr.bf16.mxu1 %v1915_v9  ;;  %v2105_v15 = vshrl.u32 %v461_v14, 7  ;;  %s1920_s14 = smov 80   ;;  %s1921_s15 = smov 112   ;;  %v536_v47 = vand.u32 127, %v461_v14  ;;  %vm609_vm5 = vcmask 1043456   ;;  %vm1000_vm6 = vcmask 130048  }
  0x2e   : > { %1591 = vmatprep.subr.bf16.mxu0 %v1915_v9  ;;  %1611 = vmatprep.mubr.msk.bf16.mxu1 %vm1916_vm2, %v1915_v9  ;;  %s1922_s20 = smov 72   ;;  %s1923_s22 = smov 104   ;;  %vm1003_vm7 = vcmask 195584  }
  0x2f   : > { %v463_v16 = vsub.s32 0, %v2105_v15  ;;  %v468_v18 = vsub.s32 1, %v2105_v15  ;;  %v478_v26 = vsub.s32 2, %v2105_v15  ;;  %vm537_vm4 = vcmp.lt.s32.totalorder %v536_v47, 5  ;;  %s1925_s25 = smov 64   ;;  %s1926_s26 = smov 56  }
  0x30   : > { %v538_v49 = vsel %vm537_vm4, 0.0, %v1924_v48  ;;  %s1927_s28 = smov 48   ;;  %s1928_s27 = smov 40  }
  0x31   : > { %v2090_v1 = vld [vmem:[#allocation2] sm:$0xff]  ;;  %1592 = vmatpush3.bf16.msra.mxu0 %v1780_v10  ;;  %v464_v19 = vrot.slane %v2109_v17, %v463_v16  ;;  %v469_v22 = vrot.slane %v2109_v17, %v468_v18  ;;  %v479_v27 = vrot.slane %v2109_v17, %v478_v26  ;;  %s1929_s17 = smov 8   ;;  %s1930_s18 = smov 16  }
  0x32   : > { %v447_v2 = vsel %vm446_vm1, %v2090_v1, 0.0  ;;  %1597 = vmatprep.subr.bf16.mxu0 %v1915_v9  ;;  %s1931_s19 = smov 24   ;;  %p1541_p1 = scmp.ne.s32.totalorder %s1897_s12, 1 }
  0x33   : > { %448 = vadd.xlane.f32.xlu0 %v447_v2 }
  0xbc   : > { %v449_v3 = vpop.xlane.xlu0 %448 }
  0xbd   : > { %v451_v4 = vmul.f32 0.03125, %v449_v3 }
  0xbf   : > { %v452_v5 = vsub.f32 %v2090_v1, %v451_v4 }
  0xc1   : > { %v453_v6 = vmul.f32 %v452_v5, %v452_v5 }
  0xc3   : > { %v454_v7 = vsel %vm446_vm1, %v453_v6, 0.0 }
  0xc4   : > { %455 = vadd.xlane.f32.xlu0 %v454_v7 }
 0x14d   : > { %v456_v11 = vpop.xlane.xlu0 %455 }
 0x14e   : > { %v457_v12 = vmul.f32 0.03125, %v456_v11 }
 0x150   : > { %v458_v13 = vadd.f32 1e-05, %v457_v12 }
 0x152   : > { %1793 = vrsqrt.f32 %v458_v13 }
 0x15f   : > { %v1794_v20 = vpop.eup %1793 }
 0x160   : > { %v460_v21 = vmul.f32 %v1794_v20, %v452_v5 }
 0x162   : > { %v465_v23 = vmul.f32 %v464_v19, %v460_v21 }
 0x164   : > { %v470_v24 = vadd.f32 %v469_v22, %v465_v23 }
 0x166   : > { %v471_v25 = vpack.c.bf16 %v470_v24, %v470_v24 }
 0x168   : > { %1594 = vmatmul.mubr.msk.bf16.vlgmr.msra.gmra.mxu0 %vm446_vm1, %v471_v25 }
 0x169   : > { %1599 = vmatprep.mubr.msk.bf16.mxu0 %vm1916_vm2, %v1915_v9 }
 0x228   : > { %v529_v28 = vpop.f32.mrf.mxu0 }
 0x229   : > { %v530_v29 = vadd.f32 %v529_v28, %v479_v27 }
 0x22a   : > { %v1595_v30 = vpop.f32.mrf.mxu0 }
 0x22b   : > { %v539_v31 = vmul.f32 0.35355338, %v530_v29  ;;  %v2119_v32 = vpack.c.bf16 %v530_v29, %v530_v29 }
 0x22c   : > { %v532_v33 = vpop.f32.mrf.mxu0 }
 0x22d   : > { %v540_v34 = vpack.c.bf16 %v539_v31, %v539_v31  ;;  %543 = vrot.lane.b32.xlu1 %v2119_v32, %s1917_s9 }
 0x22e   : > { %v1596_v35 = vpop.f32.mrf.mxu0 }
 0x22f   : > { %655 = vrot.lane.b32.xlu0 %v540_v34, %s1918_s30 }
 0x231   : > { %657 = vrot.lane.b32.xlu1 %v2119_v32, %s1919_s11 }
 0x235   : > { %768 = vrot.lane.b32.xlu1 %v2119_v32, %s1920_s14 }
 0x239   : > { %766 = vrot.lane.b32.xlu1 %v540_v34, %s1921_s15 }
 0x23d   : > { %879 = vrot.lane.b32.xlu1 %v2119_v32, %s1922_s20 }
 0x241   : > { %877 = vrot.lane.b32.xlu1 %v540_v34, %s1923_s22 }
 0x29f   : > { %v544_v36 = vpop.permute.xlu1 %543 }
 0x2a0   : > { %v550_v37 = vsel %vm545_vm3, %v544_v36, 0 }
 0x2a1   : > { %1598 = vmatpush3.bf16.xpose.msra.mxu0 %v550_v37  ;;  %v656_v41 = vpop.permute.xlu0 %655 }
 0x2a2   : > { %1603 = vmatprep.subr.bf16.mxu0 %v1915_v9 }
 0x2a3   : > { %v658_v38 = vpop.permute.xlu1 %657 }
 0x2a4   : > { %v663_v39 = vsel %vm545_vm3, %v658_v38, 0 }
 0x2a5   : > { %1610 = vmatpush3.bf16.xpose.msra.mxu1 %v663_v39 }
 0x2a6   : > { %1621 = vmatprep.subr.bf16.mxu1 %v1915_v9 }
 0x2a7   : > { %v769_v40 = vpop.permute.xlu1 %768 }
 0x2a8   : > { %1600 = vmatmul.mubr.msk.bf16.vlgmr.msra.gmra.mxu0 %vm545_vm3, %v540_v34  ;;  %v774_v43 = vsel %vm545_vm3, %v769_v40, 0 }
 0x2a9   : > { %1605 = vmatprep.mubr.msk.bf16.mxu0 %vm1916_vm2, %v1915_v9 }
 0x2ab   : > { %v767_v42 = vpop.permute.xlu1 %766 }
 0x2ac   : > { %1612 = vmatmul.mubr.msk.bf16.vlgmr.msra.gmra.mxu1 %vm545_vm3, %v656_v41 }
 0x2ad   : > { %1622 = vmatpush3.bf16.xpose.msra.mxu1 %v774_v43  ;;  %1623 = vmatprep.mubr.msk.bf16.mxu1 %vm1916_vm2, %v1915_v9 }
 0x2ae   : > { %1633 = vmatprep.subr.bf16.mxu1 %v1915_v9 }
 0x2af   : > { %v880_v44 = vpop.permute.xlu1 %879 }
 0x2b0   : > { %v885_v45 = vsel %vm545_vm3, %v880_v44, 0 }
 0x2b3   : > { %v878_v46 = vpop.permute.xlu1 %877 }
 0x2b4   : > { %1624 = vmatmul.mubr.msk.bf16.vlgmr.msra.gmra.mxu1 %vm545_vm3, %v767_v42 }
 0x2b5   : > { %1634 = vmatpush3.bf16.xpose.msra.mxu1 %v885_v45  ;;  %1635 = vmatprep.mubr.msk.bf16.mxu1 %vm1916_vm2, %v1915_v9 }
 0x2b6   : > { %1645 = vmatprep.subr.bf16.mxu1 %v1915_v9 }
 0x2bc   : > { %1636 = vmatmul.mubr.msk.bf16.vlgmr.msra.gmra.mxu1 %vm545_vm3, %v878_v46 }
 0x2bd   : > { %1649 = vmatprep.mubr.msk.bf16.mxu1 %vm1916_vm2, %v1915_v9 }
 0x368   : > { %v586_v50 = vpop.f32.mrf.mxu0 }
 0x369   : > { %v587_v51 = vadd.f32 %v586_v50, %v538_v49 }
 0x36a   : > { %v1601_v52 = vpop.f32.mrf.mxu0 }
 0x36b   : > { %v592_v53 = vsel %vm545_vm3, %v587_v51, -inf }
 0x36c   : > { %v699_v54 = vpop.f32.mrf.mxu1  ;;  %593 = vmax.xlane.f32.xlu1 %v592_v53  ;;  %v589_v55 = vpop.f32.mrf.mxu0 }
 0x36d   : > { %v700_v56 = vadd.f32 %v699_v54, %v538_v49 }
 0x36e   : > { %v1602_v57 = vpop.f32.mrf.mxu0  ;;  %v1613_v58 = vpop.f32.mrf.mxu1 }
 0x36f   : > { %v705_v59 = vsel %vm545_vm3, %v700_v56, -inf }
 0x370   : > { %706 = vmax.xlane.f32.xlu0 %v705_v59  ;;  %v702_v60 = vpop.f32.mrf.mxu1 }
 0x372   : > { %v1614_v61 = vpop.f32.mrf.mxu1 }
 0x374   : > { %v810_v62 = vpop.f32.mrf.mxu1 }
 0x375   : > { %v811_v63 = vadd.f32 %v810_v62, %v538_v49 }
 0x376   : > { %v1625_v0 = vpop.f32.mrf.mxu1 }
 0x377   : > { %v816_v2 = vsel %vm545_vm3, %v811_v63, -inf }
 0x378   : > { %v813_v3 = vpop.f32.mrf.mxu1  ;;  %817 = vmax.xlane.f32.xlu1 %v816_v2 }
 0x37a   : > { %v1626_v4 = vpop.f32.mrf.mxu1 }
 0x37b   : > { %v1781_v4 = vld [vmem:[%s2073_s16 + $0x8] sm:$0xff]  }
 0x37c   : > { %v921_v5 = vpop.f32.mrf.mxu1  ;;  %1646 = vmatpush3.bf16.msra.mxu1 %v1781_v4 }
 0x37d   : > { %v922_v6 = vadd.f32 %v921_v5, %v538_v49  ;;  %v1782_v5 = vld [vmem:[%s2073_s16] sm:$0xff]   ;;  %1647 = vmatprep.subr.bf16.mxu1 %v1915_v9 }
 0x37e   : > { %v1637_v7 = vpop.f32.mrf.mxu1 }
 0x37f   : > { %v927_v8 = vsel %vm545_vm3, %v922_v6, -inf }
 0x380   : > { %928 = vmax.xlane.f32.xlu0 %v927_v8  ;;  %v924_v10 = vpop.f32.mrf.mxu1  ;;  %1648 = vmatpush3.bf16.msra.mxu1 %v1782_v5 }
 0x381   : > { %1661 = vmatprep.subr.bf16.mxu1 %v1915_v9 }
 0x382   : > { %v1638_v11 = vpop.f32.mrf.mxu1 }
 0x3f5   : > { %v594_v12 = vpop.xlane.xlu1 %593 }
 0x3f6   : > { %v595_v13 = vsub.f32 %v587_v51, %v594_v12 }
 0x3f8   : > { %v596_v14 = vmul.f32 1.442695, %v595_v13 }
 0x3f9   : > { %v707_v16 = vpop.xlane.xlu0 %706 }
 0x3fa   : > { %1795 = vpow2.f32 %v596_v14  ;;  %v708_v18 = vsub.f32 %v700_v56, %v707_v16 }
 0x3fc   : > { %v709_v19 = vmul.f32 1.442695, %v708_v18 }
 0x3fe   : > { %1797 = vpow2.f32 %v709_v19 }
 0x401   : > { %v818_v29 = vpop.xlane.xlu1 %817 }
 0x402   : > { %v819_v30 = vsub.f32 %v811_v63, %v818_v29 }
 0x404   : > { %v820_v31 = vmul.f32 1.442695, %v819_v30 }
 0x407   : > { %v1796_v20 = vpop.eup %1795 }
 0x408   : > { %v598_v21 = vsel %vm545_vm3, %v1796_v20, 0.0 }
 0x409   : > { %v929_v22 = vpop.xlane.xlu0 %928  ;;  %599 = vadd.xlane.f32.xlu1 %v598_v21 }
 0x40a   : > { %v930_v23 = vsub.f32 %v922_v6, %v929_v22 }
 0x40b   : > { %v1798_v24 = vpop.eup %1797 }
 0x40c   : > { %v931_v25 = vmul.f32 1.442695, %v930_v23  ;;  %v711_v26 = vsel %vm545_vm3, %v1798_v24, 0.0 }
 0x40d   : > { %712 = vadd.xlane.f32.xlu0 %v711_v26  ;;  %v1067_v26 = vsub.s32 3, %v2105_v15 }
 0x40e   : > { %1799 = vpow2.f32 %v931_v25 }
 0x40f   : > { %1801 = vpow2.f32 %v820_v31 }
 0x41a   : > { %604 = vrot.lane.b32.xlu1 %v2119_v32, %s1925_s25 }
 0x41b   : > { %v1800_v27 = vpop.eup %1799 }
 0x41c   : > { %v933_v28 = vsel %vm545_vm3, %v1800_v27, 0.0  ;;  %v1802_v33 = vpop.eup %1801 }
 0x41d   : > { %934 = vadd.xlane.f32.xlu0 %v933_v28  ;;  %v822_v34 = vsel %vm545_vm3, %v1802_v33, 0.0 }
 0x433   : > { %717 = vrot.lane.b32.xlu0 %v2119_v32, %s1926_s26 }
 0x43e   : > { %823 = vadd.xlane.f32.xlu1 %v822_v34 }
 0x44f   : > { %828 = vrot.lane.b32.xlu1 %v2119_v32, %s1927_s28 }
 0x453   : > { %939 = vrot.lane.b32.xlu1 %v2119_v32, %s1928_s27 }
 0x492   : > { %v600_v35 = vpop.xlane.xlu1 %599 }
 0x493   : > { %1803 = vrcp.f32 %v600_v35 }
 0x496   : > { %v713_v36 = vpop.xlane.xlu0 %712  ;;  %v605_v37 = vpop.permute.xlu1 %604 }
 0x497   : > { %v611_v38 = vsel %vm609_vm5, %v605_v37, 0  ;;  %1805 = vrcp.f32 %v713_v36 }
 0x498   : > { %1604 = vmatpush3.bf16.msra.mxu0 %v611_v38 }
 0x499   : > { %1615 = vmatprep.subr.bf16.mxu0 %v1915_v9 }
 0x4a0   : > { %v1804_v39 = vpop.eup %1803 }
 0x4a1   : > { %v602_v40 = vmul.f32 %v1804_v39, %v1796_v20 }
 0x4a3   : > { %v603_v41 = vpack.c.bf16 %v602_v40, %v602_v40 }
 0x4a4   : > { %v1806_v42 = vpop.eup %1805 }
 0x4a5   : > { %1606 = vmatmul.mubr.msk.bf16.vlgmr.msra.gmra.mxu0 %vm545_vm3, %v603_v41  ;;  %v715_v32 = vmul.f32 %v1806_v42, %v1798_v24  ;;  %v1783_v41 = vld [vmem:[%s2078_s29 + $0x8] sm:$0xff]  }
 0x4a6   : > { %v935_v43 = vpop.xlane.xlu0 %934  ;;  %1617 = vmatprep.mubr.msk.bf16.mxu0 %vm1916_vm2, %v1915_v9 }
 0x4a7   : > { %v716_v46 = vpack.c.bf16 %v715_v32, %v715_v32 }
 0x4aa   : > { %v718_v44 = vpop.permute.xlu0 %717 }
 0x4ab   : > { %v723_v45 = vsel %vm609_vm5, %v718_v44, 0  ;;  %v1085_v44 = vsub.s32 4, %v2105_v15 }
 0x4ac   : > { %1616 = vmatpush3.bf16.msra.mxu0 %v723_v45  ;;  %v1090_v45 = vsub.s32 5, %v2105_v15 }
 0x4ad   : > { %1627 = vmatprep.subr.bf16.mxu0 %v1915_v9 }
 0x4af   : > { %1618 = vmatmul.mubr.msk.bf16.vlgmr.msra.gmra.mxu0 %vm545_vm3, %v716_v46  ;;  %v1086_v46 = vrot.slane %v2109_v17, %v1085_v44 }
 0x4b0   : > { %1629 = vmatprep.mubr.msk.bf16.mxu0 %vm1916_vm2, %v1915_v9 }
 0x4c7   : > { %v824_v47 = vpop.xlane.xlu1 %823 }
 0x4c8   : > { %1807 = vrcp.f32 %v824_v47 }
 0x4c9   : > { %1809 = vrcp.f32 %v935_v43 }
 0x4cb   : > { %v829_v48 = vpop.permute.xlu1 %828 }
 0x4cc   : > { %v834_v49 = vsel %vm609_vm5, %v829_v48, 0 }
 0x4cd   : > { %1628 = vmatpush3.bf16.msra.mxu0 %v834_v49  ;;  %v1091_v49 = vrot.slane %v2109_v17, %v1090_v45 }
 0x4ce   : > { %1639 = vmatprep.subr.bf16.mxu0 %v1915_v9 }
 0x4cf   : > { %v940_v52 = vpop.permute.xlu1 %939 }
 0x4d0   : > { %v945_v55 = vsel %vm609_vm5, %v940_v52, 0 }
 0x4d5   : > { %v1808_v50 = vpop.eup %1807 }
 0x4d6   : > { %v826_v51 = vmul.f32 %v1808_v50, %v1802_v33  ;;  %v1810_v54 = vpop.eup %1809 }
 0x4d7   : > { %v937_v56 = vmul.f32 %v1810_v54, %v1800_v27  ;;  %v1068_v27 = vrot.slane %v2109_v17, %v1067_v26  ;;  %v1786_v54 = vld [vmem:[%s2083_s23 + $0x30] sm:$0xff]  }
 0x4d8   : > { %v827_v53 = vpack.c.bf16 %v826_v51, %v826_v51 }
 0x4d9   : > { %v938_v57 = vpack.c.bf16 %v937_v56, %v937_v56  ;;  %v1788_v56 = vld [vmem:[%s2083_s23 + $0x20] sm:$0xff]  }
 0x4da   : > { %1630 = vmatmul.mubr.msk.bf16.vlgmr.msra.gmra.mxu0 %vm545_vm3, %v827_v53  ;;  %v1785_v53 = vld [vmem:[%s2083_s23 + $0x38] sm:$0xff]  }
 0x4db   : > { %1640 = vmatpush3.bf16.msra.mxu0 %v945_v55  ;;  %1641 = vmatprep.mubr.msk.bf16.mxu0 %vm1916_vm2, %v1915_v9  ;;  %v1787_v55 = vld [vmem:[%s2083_s23 + $0x28] sm:$0xff]  }
 0x4dc   : > { %1653 = vmatprep.subr.bf16.mxu0 %v1915_v9 }
 0x4e2   : > { %1642 = vmatmul.mubr.msk.bf16.vlgmr.msra.gmra.mxu0 %vm545_vm3, %v938_v57  ;;  %v1789_v57 = vld [vmem:[%s2083_s23 + $0x18] sm:$0xff]  }
 0x4e3   : > { %1657 = vmatprep.mubr.msk.bf16.mxu0 %vm1916_vm2, %v1915_v9  ;;  %1654 = vmatpush3.bf16.msra.mxu0 %v1783_v41 }
 0x4e4   : > { %1655 = vmatprep.subr.bf16.mxu0 %v1915_v9 }
 0x565   : > { %v647_v58 = vpop.f32.mrf.mxu0 }
 0x566   : > { %v653_v20 = vpack.c.bf16 %v647_v58, %v647_v58  ;;  %v1790_v58 = vld [vmem:[%s2083_s23 + $0x10] sm:$0xff]  }
 0x567   : > { %v1607_v59 = vpop.f32.mrf.mxu0 }
 0x568   : > { %v1791_v59 = vld [vmem:[%s2083_s23 + $0x8] sm:$0xff]  }
 0x569   : > { %v650_v60 = vpop.f32.mrf.mxu0 }
 0x56a   : > { %v1792_v60 = vld [vmem:[%s2083_s23] sm:$0xff]  }
 0x56b   : > { %v1608_v61 = vpop.f32.mrf.mxu0 }
 0x56c   : > { %v1100_v61 = vsub.s32 6, %v2105_v15 }
 0x56f   : > { %v759_v62 = vpop.f32.mrf.mxu0 }
 0x570   : > { %v765_v63 = vpack.c.bf16 %v759_v62, %v759_v62  ;;  %v1101_v62 = vrot.slane %v2109_v17, %v1100_v61 }
 0x571   : > { %v1619_v0 = vpop.f32.mrf.mxu0 }
 0x572   : > { %989 = vrot.lane.b32.xlu0 %v765_v63, %s1929_s17 }
 0x573   : > { %v762_v2 = vpop.f32.mrf.mxu0 }
 0x575   : > { %v1620_v3 = vpop.f32.mrf.mxu0 }
 0x59a   : > { %v870_v6 = vpop.f32.mrf.mxu0 }
 0x59b   : > { %v876_v7 = vpack.c.bf16 %v870_v6, %v870_v6 }
 0x59c   : > { %v1631_v8 = vpop.f32.mrf.mxu0 }
 0x59d   : > { %992 = vrot.lane.b32.xlu1 %v876_v7, %s1930_s18 }
 0x59e   : > { %v873_v10 = vpop.f32.mrf.mxu0 }
 0x5a0   : > { %v1632_v11 = vpop.f32.mrf.mxu0 }
 0x5a2   : > { %v981_v12 = vpop.f32.mrf.mxu0 }
 0x5a3   : > { %v987_v13 = vpack.c.bf16 %v981_v12, %v981_v12  ;;  %v1273_v12 = vsub.s32 7, %v2105_v15 }
 0x5a4   : > { %v1643_v14 = vpop.f32.mrf.mxu0 }
 0x5a5   : > { %995 = vrot.lane.b32.xlu0 %v987_v13, %s1931_s19  ;;  %v1274_v13 = vrot.slane %v2109_v17, %v1273_v12 }
 0x5a6   : > { %v984_v16 = vpop.f32.mrf.mxu0 }
 0x5a8   : > { %v1644_v18 = vpop.f32.mrf.mxu0 }
 0x5e4   : > { %v990_v19 = vpop.permute.xlu0 %989 }
 0x5e5   : > { %v999_v22 = vsel %vm545_vm3, %v653_v20, %v990_v19 }
 0x60f   : > { %v993_v21 = vpop.permute.xlu1 %992 }
 0x610   : > { %v1002_v23 = vsel %vm1000_vm6, %v999_v22, %v993_v21 }
 0x617   : > { %v996_v24 = vpop.permute.xlu0 %995 }
 0x618   : > { %v1005_v25 = vsel %vm1003_vm7, %v1002_v23, %v996_v24 }
 0x619   : > { %1650 = vmatmul.mubr.msk.bf16.vlgmr.msra.gmra.mxu1 %vm446_vm1, %v1005_v25 }
 0x61a   : > { %1677 = vmatprep.mubr.msk.bf16.mxu1 %vm1916_vm2, %v1915_v9  ;;  %1662 = vmatpush3.bf16.msra.mxu1 %v1785_v53 }
 0x61b   : > { %1663 = vmatprep.subr.bf16.mxu1 %v1915_v9 }
 0x61e   : > { %1664 = vmatpush3.bf16.msra.mxu1 %v1786_v54 }
 0x61f   : > { %1665 = vmatprep.subr.bf16.mxu1 %v1915_v9 }
 0x622   : > { %1666 = vmatpush3.bf16.msra.mxu1 %v1787_v55 }
 0x623   : > { %1667 = vmatprep.subr.bf16.mxu1 %v1915_v9 }
 0x626   : > { %1668 = vmatpush3.bf16.msra.mxu1 %v1788_v56 }
 0x627   : > { %1669 = vmatprep.subr.bf16.mxu1 %v1915_v9 }
 0x62a   : > { %1670 = vmatpush3.bf16.msra.mxu1 %v1789_v57 }
 0x62b   : > { %1671 = vmatprep.subr.bf16.mxu1 %v1915_v9 }
 0x62e   : > { %1672 = vmatpush3.bf16.msra.mxu1 %v1790_v58 }
 0x62f   : > { %1673 = vmatprep.subr.bf16.mxu1 %v1915_v9 }
 0x632   : > { %1674 = vmatpush3.bf16.msra.mxu1 %v1791_v59 }
 0x633   : > { %1675 = vmatprep.subr.bf16.mxu1 %v1915_v9 }
 0x636   : > { %1676 = vmatpush3.bf16.msra.mxu1 %v1792_v60 }
 0x6d9   : > { %v1058_v28 = vpop.f32.mrf.mxu1 }
 0x6da   : > { %v1064_v29 = vadd.f32 %v1058_v28, %v2090_v1  ;;  %v1784_v1 = vld [vmem:[%s2078_s29] sm:$0xff]  }
 0x6db   : > { %v1651_v30 = vpop.f32.mrf.mxu1  ;;  %1656 = vmatpush3.bf16.msra.mxu0 %v1784_v1 }
 0x6dc   : > { %v2189_v31 = vadd.f32 %v1068_v27, %v1064_v29 }
 0x6dd   : > { %v1061_v33 = vpop.f32.mrf.mxu1 }
 0x6de   : > { %v1070_v34 = vsel %vm446_vm1, %v2189_v31, 0.0 }
 0x6df   : > { %1071 = vadd.xlane.f32.xlu1 %v1070_v34  ;;  %v1652_v35 = vpop.f32.mrf.mxu1 }
 0x768   : > { %v1072_v36 = vpop.xlane.xlu1 %1071 }
 0x769   : > { %v1073_v37 = vmul.f32 0.03125, %v1072_v36 }
 0x76b   : > { %v1074_v38 = vsub.f32 %v2189_v31, %v1073_v37 }
 0x76d   : > { %v1075_v39 = vmul.f32 %v1074_v38, %v1074_v38 }
 0x76f   : > { %v1076_v40 = vsel %vm446_vm1, %v1075_v39, 0.0 }
 0x770   : > { %1077 = vadd.xlane.f32.xlu0 %v1076_v40 }
 0x7f9   : > { %v1078_v42 = vpop.xlane.xlu0 %1077 }
 0x7fa   : > { %v1079_v43 = vmul.f32 0.03125, %v1078_v42 }
 0x7fc   : > { %v1080_v32 = vadd.f32 1e-05, %v1079_v43 }
 0x7fe   : > { %1811 = vrsqrt.f32 %v1080_v32 }
 0x80b   : > { %v1812_v47 = vpop.eup %1811 }
 0x80c   : > { %v1082_v48 = vmul.f32 %v1812_v47, %v1074_v38 }
 0x80e   : > { %v1087_v50 = vmul.f32 %v1086_v46, %v1082_v48 }
 0x810   : > { %v1092_v51 = vadd.f32 %v1091_v49, %v1087_v50 }
 0x812   : > { %v1093_v52 = vpack.c.bf16 %v1092_v51, %v1092_v51 }
 0x814   : > { %1658 = vmatmul.mubr.msk.bf16.vlgmr.msra.gmra.mxu0 %vm446_vm1, %v1093_v52 }
 0x8d4   : > { %v1151_v63 = vpop.f32.mrf.mxu0 }
 0x8d5   : > { %v1152_v0 = vadd.f32 %v1151_v63, %v1101_v62 }
 0x8d6   : > { %v1659_v2 = vpop.f32.mrf.mxu0 }
 0x8d7   : > { %v1532_v3 = vmul.f32 -1.702, %v1152_v0 }
 0x8d8   : > { %v1154_v4 = vpop.f32.mrf.mxu0 }
 0x8d9   : > { %v1159_v5 = vmul.f32 1.442695, %v1532_v3 }
 0x8da   : > { %v1660_v6 = vpop.f32.mrf.mxu0 }
 0x8db   : > { %1813 = vpow2.f32 %v1159_v5 }
 0x8e8   : > { %v1814_v7 = vpop.eup %1813 }
 0x8e9   : > { %v1161_v8 = vadd.f32 1.0, %v1814_v7 }
 0x8eb   : > { %1815 = vrcp.f32 %v1161_v8 }
 0x8f8   : > { %v1816_v10 = vpop.eup %1815 }
 0x8f9   : > { %v1164_v11 = vmul.f32 %v1816_v10, %v1152_v0 }
 0x8fb   : > { %v1165_v9 = vpack.c.bf16 %v1164_v11, %v1164_v11 }
 0x8fd   : > { %1678 = vmatmul.mubr.bf16.vlgmr.msra.gmra.mxu1 %v1165_v9 }
 0x9bd   : > { %v1264_v14 = vpop.f32.mrf.mxu1 }
 0x9be   : > { %v1270_v16 = vadd.f32 %v1264_v14, %v2189_v31 }
 0x9bf   : > { %v1679_v18 = vpop.f32.mrf.mxu1  ;;  %1280 = sbr.rel (%p1541_p1) target bundleno = 3010 (0xbc2), region = 64 }
 0x9c0   : > { %v1275_v19 = vadd.f32 %v1274_v13, %v1270_v16 }
 0x9c1   : > { %v1267_v20 = vpop.f32.mrf.mxu1 }
 0x9c2   : > { %1276 = vst.msk [vmem:[#allocation2] sm:$0xff] %vm446_vm1, %v1275_v19 }
 0x9c3   : > { %v1680_v21 = vpop.f32.mrf.mxu1 }
 0x9c4   : > { %vm1283_vm8 = vcmask 253952   ;;  %v1817_v26 = vld [vmem:[%s2294_s8 + $0x8] sm:$0xff]   ;;  %v1932_v27 = vmov 0.0   ;;  %vm1933_vm9 = vmmov 0   ;;  %v1818_v28 = vld [vmem:[%s2294_s8] sm:$0xff]  }
 0x9c5   : > { %v1284_v22 = vsel %vm1283_vm8, %v1275_v19, 0.0  ;;  %1681 = vmatprep.subr.bf16.mxu0 %v1932_v27  ;;  %1685 = vmatprep.mubr.msk.bf16.mxu0 %vm1933_vm9, %v1932_v27  ;;  %v1281_v34 = vld [vmem:[%s2292_s6] sm:$0x1] }
 0x9c6   : > { %1285 = vadd.xlane.f32.xlu0 %v1284_v22  ;;  %1682 = vmatpush3.bf16.msra.mxu0 %v1817_v26  ;;  %v1282_v36 = vld [vmem:[%s2293_s7] sm:$0x1] }
 0x9c7   : > { %1683 = vmatprep.subr.bf16.mxu0 %v1932_v27 }
 0x9ca   : > { %1684 = vmatpush3.bf16.msra.mxu0 %v1818_v28 }
 0xa4f   : > { %v1286_v23 = vpop.xlane.xlu0 %1285 }
 0xa50   : > { %v1287_v24 = vmul.f32 0.03125, %v1286_v23 }
 0xa52   : > { %v1288_v15 = vsub.f32 %v1275_v19, %v1287_v24 }
 0xa54   : > { %v1289_v25 = vmul.f32 %v1288_v15, %v1288_v15 }
 0xa56   : > { %v1290_v17 = vsel %vm1283_vm8, %v1289_v25, 0.0 }
 0xa57   : > { %1291 = vadd.xlane.f32.xlu0 %v1290_v17 }
 0xae0   : > { %v1292_v29 = vpop.xlane.xlu0 %1291 }
 0xae1   : > { %v1293_v30 = vmul.f32 0.03125, %v1292_v29 }
 0xae3   : > { %v1294_v31 = vadd.f32 1e-05, %v1293_v30 }
 0xae5   : > { %1819 = vrsqrt.f32 %v1294_v31 }
 0xaf2   : > { %v1820_v33 = vpop.eup %1819 }
 0xaf3   : > { %v1296_v35 = vmul.f32 %v1820_v33, %v1288_v15 }
 0xaf5   : > { %v1297_v37 = vmul.f32 %v1296_v35, %v1281_v34 }
 0xaf7   : > { %v1298_v38 = vadd.f32 %v1297_v37, %v1282_v36 }
 0xaf9   : > { %v1299_v39 = vpack.c.bf16 %v1298_v38, %v1298_v38 }
 0xafb   : > { %1686 = vmatmul.mubr.msk.bf16.vlgmr.msra.gmra.mxu0 %vm446_vm1, %v1299_v39 }
 0xbbb   : > { %v1353_v40 = vpop.f32.mrf.mxu0 }
 0xbbc   : > { %1359 = vst [vmem:[%s2087_s0] sm:$0x1] %v1353_v40 }
 0xbbd   : > { %v1687_v41 = vpop.f32.mrf.mxu0 }
 0xbbf   : > { %v1356_v1 = vpop.f32.mrf.mxu0 }
 0xbc1   : > { %v1688_v42 = vpop.f32.mrf.mxu0 }
 0xbc2 PF: > { %s1545_s14 = sshll.u32 %s1901_s13, 4  ;;  %s2320_s22 = sld [smem:[#allocation16_spill]] }
 0xbc3   : > { %s1373_s26 = sshll.u32 %s2087_s0, 4  ;;  %s2321_s28 = sand.u32 1, %s1889_s10   ;;  %s1374_s26 = int_to_ptr.vmem [resolvable:$true] %s1373_s26 }
 0xbc4   : > { %s1361_s27 = scalar_lea.sflag [#allocation4], %s2321_s28  ;;  %s1821_s17 = scalar_lea.vmem %s1374_s26, 16 }
 0xbc5   : > { %p1822_p2 = scmp.ne.s32.totalorder %s1374_s26, %s1821_s17  ;;  %s1934_s18 = smov [#allocation3]  }
 0xbc6   : > { %s1825_s19 = sshll.u32 %s1934_s18, 4  ;;  %s1826_s19 = int_to_ptr.vmem [resolvable:$false] %s1825_s19 }
 0xbc7   : > { %p1823_p4 = pnand %p1822_p2, %p2034_p3  ;;  %s1827_s16 = scalar_lea.vmem %s1826_s19, 32 }
 0xbc8   : > { %s1371_s25 = scalar_lea.hbm %s2320_s22, %s1545_s14  ;;  %p1828_p6 = scmp.lt.s32.totalorder %s1374_s26, %s1826_s19 }
 0xbc9   : > { %p1824_p5 = pneg %p1823_p4  ;;  %p1829_p7 = scmp.lt.s32.totalorder %s1827_s16, %s1821_s17 }
 0xbcb   : > { %p1830_p8 = por %p1829_p7, %p1828_p6 }
 0xbcd   : > { %p1831_p10 = pnand %p1830_p8, %p1824_p5 }
 0xbcf   : > { %1834 = shalt.err (!%p1831_p10)
}
 0xbd0   : > { %s1835_s13 = scalar_lea.hbm %s1371_s25, 16  ;;  %s1839_s12 = scalar_lea.hbm %s2320_s22, 32 }
 0xbd1   : > { %p1836_p11 = scmp.ne.s32.totalorder %s1371_s25, %s1835_s13  ;;  %p1840_p0 = scmp.lt.s32.totalorder %s1371_s25, %s2320_s22 }
 0xbd2   : > { %p1841_p1 = scmp.lt.s32.totalorder %s1839_s12, %s1835_s13 }
 0xbd3   : > { %p1837_p12 = pnand %p1836_p11, %p2034_p3 }
 0xbd4   : > { %p1842_p2 = por %p1841_p1, %p1840_p0 }
 0xbd5   : > { %p1838_p13 = pneg %p1837_p12 }
 0xbd7   : > { %p1843_p4 = pnand %p1842_p2, %p1838_p13 }
 0xbd9   : > { %1846 = shalt.err (!%p1843_p4)
}
 0xbda   : > { %1689 = dma.vmem_to_hbm [thread:$0]  (%p2034_p3), %s1374_s26, 16, %s1371_s25, %s1361_s27  }
 0xbdb PF: > { %s2322_s9 = sld [smem:[#allocation10_spill]] }
 0xbdc   : > { %s2323_s30 = sld [smem:[#allocation6_spill]] }
 0xbe1   : > { %p1695_p5 = scmp.ge.s32.totalorder %s2322_s9, 2 }
 0xbe2   : > { %s1385_s14 = sand.u32 1, %s2323_s30  }
 0xbe3   : > { %p1692_p6 = pnand %p1695_p5, %p2044_p9  ;;  %s1386_s15 = scalar_lea.sflag [#allocation4], %s1385_s14 }
 0xbe5   : > { %p1693_p7 = pneg %p1692_p6 }
 0xbe7   : > { %1880 = dma.done.wait (%p1693_p7), %s1386_s15, 16  }
 0xbe8   : > { %1882 = vsyncadd (%p1693_p7), %s1386_s15, 4294967280  ;;  %s22_s16 = sadd.s32 1, %s2322_s9   ;;  %s2325_s20 = sld [smem:[#allocation7_spill]] }
 0xbe9   : > { %p19_p8 = scmp.ge.s32.totalorder %s22_s16, 6   ;;  %s2326_s11 = sld [smem:[#allocation14_spill]] }
 0xbea   : > { %s2327_s12 = sld [smem:[#allocation8_spill]]  ;;  %s2331_s30 = smov %s1889_s10 }
 0xbeb   : > { %s2328_s13 = sld [smem:[#allocation9_spill]]  ;;  %21 = sbr.rel (!%p19_p8) target bundleno = 8 (0x8), region = 114 }
 0xbec   : > { %s2329_s14 = sld [smem:[#allocation11_spill]] }
 0xbed   : > { %s2330_s15 = sld [smem:[#allocation12_spill]] }
 0xbee   : > { %s2332_s10 = smov %s2325_s20 }
 0xbf0   :  { %1390 = vsyncpa [#allocation4], 1 }
 0xbf1   :  { %1392 = vsyncpa [#allocation4 + $0x1], 1 }

</bundles_post_ra>
